<compile_context>
chip_gen: v6e
topology: v6e:2x2x1
jax: 0.10.0
libtpu: 0.0.40
codegen_flags: <defaults>
</compile_context>

<pallas_src>
import functools

import jax
import jax.numpy as jnp
from jax.experimental import pallas as pl
from jax.experimental.pallas import tpu as pltpu


def _disp_head_kernel(x_ref, w_ref, b_ref, cw_ref, o_ref):
    """One (TH x W) spatial tile of one image per grid step.

    x_ref : (1, TH+2, W+2, Cin)  bf16  halo'd NHWC input tile
    w_ref : (9, Cin, Cout_p)     bf16  conv taps, (ky, kx)-major
    b_ref : (1, Cout_p)          f32   bias (-1e30 in padded channels)
    cw_ref: (1, Cout_p, 128)     f32   col 0 = bin centers, col 1 = ones
    o_ref : (1, TH, W)           f32   depth tile
    """
    tile = x_ref[0]                                      # (TH+2, W+2, Cin)
    th = tile.shape[0] - 2
    w = tile.shape[1] - 2
    cin = tile.shape[2]

    # Hoist the 3 column (sublane) shifts; the row (dy) shifts below are free
    # slices of the leading axis.
    cols = [tile[:, dx:dx + w, :] for dx in range(3)]    # 3 x (TH+2, W, Cin)

    # ---- 3x3 conv: 9 accumulated MXU matmuls, f32 accumulation ----
    acc = None
    for dy in range(3):
        for dx in range(3):
            lhs = cols[dx][dy:dy + th].reshape(th * w, cin)      # (TH*W, Cin)
            part = jnp.dot(lhs, w_ref[3 * dy + dx],
                           preferred_element_type=jnp.float32)   # (TH*W, Cout_p)
            acc = part if acc is None else acc + part
    acc = acc + b_ref[...]                                       # conv bias

    # ---- fused softmax + bin-center weighted mean over channels ----
    m = jnp.max(acc, axis=-1, keepdims=True)
    e = jnp.exp(acc - m)                      # padded channels -> exactly 0
    # Both channel reductions as a single MXU matvec: col 0 = centers, col 1 = 1.
    sums = jnp.dot(e, cw_ref[0], preferred_element_type=jnp.float32)  # (TH*W,128)
    num = sums[:, 0:1]                        # sum(e * centers)
    den = sums[:, 1:2]                        # sum(e)
    depth = num / den                         # exact reciprocal (tiny; keep precise)

    o_ref[0] = depth.reshape(th, w)


def _round_up(n, m):
    return (n + m - 1) // m * m


def _vmem_budget():
    """(per-tile byte budget, vmem_limit_bytes), derived from the chip generation."""
    try:
        cap = int(pltpu.get_tpu_info().vmem_capacity_bytes)
    except Exception:
        cap = 64 * 1024 * 1024              # conservative default (v7x per-TC VMEM)
    limit = max(32 * 1024 * 1024, min(cap * 3 // 4, 96 * 1024 * 1024))
    return limit // 3, limit


def _pick_tile_h(H, W, Cin, Cout_p, budget_bytes):
    """Largest multiple-of-8 divisor of H whose working set fits the budget.

    Prefers >= 2 spatial tiles so both v7x TensorCores get work even at B == 1.
    """
    lane_cin = _round_up(max(Cin, 1), 128)   # VMEM lane padding of the Cin dim
    candidates = [th for th in range(8, H + 1, 8) if H % th == 0]
    if not candidates:
        return H                             # odd H: single full-image tile

    def footprint(th):
        in_tile = (th + 2) * (W + 2) * lane_cin * 2      # bf16 input tile
        cols = 3 * (th + 2) * W * lane_cin * 2           # hoisted column shifts
        logits = 3 * th * W * Cout_p * 4                 # acc / exp / slack (f32)
        out_blk = th * W * 4
        return 2 * in_tile + cols + logits + 2 * out_blk

    fitting = [th for th in candidates if footprint(th) <= budget_bytes]
    if not fitting:
        return candidates[0]
    multi = [th for th in fitting if H // th >= 2]
    return max(multi) if multi else max(fitting)


def disp_head_forward(x_nchw, weight, bias, centers, scale, *, tile_h=None):
    """DispHead forward.

    x_nchw  : (B, Cin, H, W)      float32
    weight  : (Cout, Cin, 3, 3)   float32 (PyTorch Conv2d layout)
    bias    : (Cout,)             float32
    centers : (B, Cout, 1, 1)     float32
    scale   : python int
    returns : (B, 1, H*scale, W*scale) if scale > 1 else (B, 1, H, W)
    """
    B, Cin, H, W = x_nchw.shape
    Cout = weight.shape[0]
    Cout_p = _round_up(Cout, 128)

    budget, vmem_limit = _vmem_budget()
    if tile_h is None:
        tile_h = _pick_tile_h(H, W, Cin, Cout_p, budget)
    assert H % tile_h == 0, (H, tile_h)
    assert tile_h % 8 == 0 or tile_h == H, \
        "tile_h must be a multiple of 8 (or the full height)"
    n_th = H // tile_h

    # --- glue: one fused XLA layout pass over the input ---
    # TODO(synk): have the producing layer emit NHWC bf16 directly; this
    # transpose + cast (+ halo'd tiling) pass is the remaining extra HBM traffic.
    x_nhwc = jnp.transpose(x_nchw, (0, 2, 3, 1)).astype(jnp.bfloat16)
    x_pad = jnp.pad(x_nhwc, ((0, 0), (1, 1), (1, 1), (0, 0)))     # (B,H+2,W+2,Cin)
    # Materialize the 2-row halo per tile so the kernel input is plain-blocked
    # (auto-pipelined; prefetch is never exposed).  Costs +2/tile_h extra rows.
    tiles = [x_pad[:, t * tile_h: t * tile_h + tile_h + 2] for t in range(n_th)]
    x_tiles = jnp.stack(tiles, axis=1).reshape(B * n_th, tile_h + 2, W + 2, Cin)

    # Conv taps: (Cout,Cin,ky,kx) -> (ky,kx,Cin,Cout) -> (9,Cin,Cout_p) zero-padded.
    w9 = jnp.transpose(weight, (2, 3, 1, 0)).reshape(9, Cin, Cout)
    w9 = jnp.pad(w9, ((0, 0), (0, 0), (0, Cout_p - Cout))).astype(jnp.bfloat16)
    # Bias: -1e30 in padded channels so exp() of their logits is exactly 0.
    b2d = jnp.full((1, Cout_p), -1e30, jnp.float32)
    b2d = b2d.at[:, :Cout].set(bias.astype(jnp.float32)[None, :])
    # Reduction matrix: col 0 = centers, col 1 = ones (0 in padded channels).
    c2d = centers.reshape(B, Cout).astype(jnp.float32)
    cw = jnp.zeros((B, Cout_p, 128), jnp.float32)
    cw = cw.at[:, :Cout, 0].set(c2d)
    cw = cw.at[:, :Cout, 1].set(1.0)

    out = pl.pallas_call(
        _disp_head_kernel,
        out_shape=jax.ShapeDtypeStruct((B, H, W), jnp.float32),
        grid=(B, n_th),
        in_specs=[
            pl.BlockSpec((1, tile_h + 2, W + 2, Cin),
                         lambda b, t: (b * n_th + t, 0, 0, 0)),      # halo'd tile
            pl.BlockSpec((9, Cin, Cout_p), lambda b, t: (0, 0, 0)),  # weights (resident)
            pl.BlockSpec((1, Cout_p), lambda b, t: (0, 0)),          # bias (resident)
            pl.BlockSpec((1, Cout_p, 128), lambda b, t: (b, 0, 0)),  # centers|ones of image b
        ],
        out_specs=pl.BlockSpec((1, tile_h, W), lambda b, t: (b, t, 0)),
        compiler_params=pltpu.CompilerParams(
            # Every (b, t) step is independent: both axes parallel (v7x 2 TCs
            # get work even for B == 1; a measured no-op on v5e/v6e).
            dimension_semantics=("parallel", "parallel"),
            vmem_limit_bytes=vmem_limit,
        ),
    )(x_tiles, w9, b2d, cw)

    out = out[:, None]                                    # (B, 1, H, W)
    if scale > 1:
        # Bilinear, align_corners=False semantics for integer scale factors.
        # TODO(synk): fuse the integer-scale bilinear upsample into the kernel
        # epilogue to avoid this extra HBM round-trip of the depth map.
        out = jax.image.resize(out, (B, 1, H * scale, W * scale), method="bilinear")
    return out


def _disp_head_reference(x, weight, bias, centers, scale):
    """Pure-JAX reference using the same bf16 conv precision as the kernel."""
    y = jax.lax.conv_general_dilated(
        x.astype(jnp.bfloat16), weight.astype(jnp.bfloat16),
        window_strides=(1, 1), padding=((1, 1), (1, 1)),
        dimension_numbers=("NCHW", "OIHW", "NCHW"),
        preferred_element_type=jnp.float32)
    y = y + bias[None, :, None, None]
    p = jax.nn.softmax(y, axis=1)
    d = jnp.sum(p * centers, axis=1, keepdims=True)
    if scale > 1:
        B, _, H, W = d.shape
        d = jax.image.resize(d, (B, 1, H * scale, W * scale), method="bilinear")
    return d


if __name__ == "__main__":
    # Small shapes consistent with the module.
    B, Cin, H, W = 2, 16, 16, 16
    n_bins = 32
    scale = 2

    key = jax.random.PRNGKey(0)
    k1, k2, k3, k4 = jax.random.split(key, 4)

    x = jax.random.normal(k1, (B, Cin, H, W), dtype=jnp.float32)
    weight = 0.1 * jax.random.normal(k2, (n_bins, Cin, 3, 3), dtype=jnp.float32)
    bias = 0.01 * jax.random.normal(k3, (n_bins,), dtype=jnp.float32)
    centers = jax.nn.softplus(
        jax.random.normal(k4, (B, n_bins, 1, 1), dtype=jnp.float32)) + 0.1

    # tile_h=8 -> 2 spatial tiles per image: exercises the halo'd tiling path.
    fwd = jax.jit(functools.partial(disp_head_forward, scale=scale, tile_h=8))
    y = fwd(x, weight, bias, centers)
    jax.block_until_ready(y)

    y_ref = _disp_head_reference(x, weight, bias, centers, scale)

    assert y.shape == (B, 1, H * scale, W * scale), y.shape
    assert bool(jnp.all(jnp.isfinite(y)))
    max_err = float(jnp.max(jnp.abs(y - y_ref)))
    assert max_err < 3e-2, max_err
    print("KERNEL_OK")
</pallas_src>

<mosaic_0001>
module attributes {stable_mosaic.version = 11 : i64} {
  func.func @_disp_head_kernel(%arg0: i32, %arg1: i32, %arg2: memref<1x10x18x16xbf16, #tpu.memory_space<vmem>>, %arg3: memref<9x16x128xbf16, #tpu.memory_space<vmem>>, %arg4: memref<1x128xf32, #tpu.memory_space<vmem>>, %arg5: memref<1x128x128xf32, #tpu.memory_space<vmem>>, %arg6: memref<1x8x16xf32, #tpu.memory_space<vmem>>) attributes {dimension_semantics = [#tpu.dimension_semantics<parallel>, #tpu.dimension_semantics<parallel>], iteration_bounds = array<i64: 2, 2>, scalar_prefetch = 0 : i64, scratch_operands = 0 : i64, tpu.core_type = #tpu.core_type<tc>, window_params = [{transform_indices = @transform_0, window_bounds = array<i64: 1, 10, 18, 16>}, {pipeline_mode = #tpu.pipeline_mode<synchronous>, transform_indices = @transform_1, window_bounds = array<i64: 9, 16, 128>}, {pipeline_mode = #tpu.pipeline_mode<synchronous>, transform_indices = @transform_2, window_bounds = array<i64: 1, 128>}, {transform_indices = @transform_3, window_bounds = array<i64: 1, 128, 128>}, {transform_indices = @transform_4, window_bounds = array<i64: 1, 8, 16>}]} {
    %c0 = arith.constant 0 : index
    %c0_0 = arith.constant 0 : index
    %c0_1 = arith.constant 0 : index
    %c0_2 = arith.constant 0 : index
    %0 = vector.load %arg2[%c0, %c0_0, %c0_1, %c0_2] : memref<1x10x18x16xbf16, #tpu.memory_space<vmem>>, vector<1x10x18x16xbf16>
    %1 = vector.shape_cast %0 : vector<1x10x18x16xbf16> to vector<10x18x16xbf16>
    %2 = vector.extract_strided_slice %1 {offsets = [0, 0, 0], sizes = [10, 16, 16], strides = [1, 1, 1]} : vector<10x18x16xbf16> to vector<10x16x16xbf16>
    %3 = vector.extract_strided_slice %1 {offsets = [0, 1, 0], sizes = [10, 16, 16], strides = [1, 1, 1]} : vector<10x18x16xbf16> to vector<10x16x16xbf16>
    %4 = vector.extract_strided_slice %1 {offsets = [0, 2, 0], sizes = [10, 16, 16], strides = [1, 1, 1]} : vector<10x18x16xbf16> to vector<10x16x16xbf16>
    %5 = vector.extract_strided_slice %2 {offsets = [0, 0, 0], sizes = [8, 16, 16], strides = [1, 1, 1]} : vector<10x16x16xbf16> to vector<8x16x16xbf16>
    %6 = vector.shape_cast %5 : vector<8x16x16xbf16> to vector<128x16xbf16>
    %c0_3 = arith.constant 0 : index
    %c0_4 = arith.constant 0 : index
    %c0_5 = arith.constant 0 : index
    %7 = vector.load %arg3[%c0_3, %c0_4, %c0_5] : memref<9x16x128xbf16, #tpu.memory_space<vmem>>, vector<1x16x128xbf16>
    %8 = vector.shape_cast %7 : vector<1x16x128xbf16> to vector<16x128xbf16>
    %cst = arith.constant dense<0.000000e+00> : vector<128x128xf32>
    %9 = tpu.matmul %6, %8, %cst {dimension_numbers = #tpu.dot_dimension_numbers<[1], [0], [0], [1], [0, 0, 1, 1], [], []>} : vector<128x16xbf16>, vector<16x128xbf16>, vector<128x128xf32> -> vector<128x128xf32>
    %10 = vector.extract_strided_slice %3 {offsets = [0, 0, 0], sizes = [8, 16, 16], strides = [1, 1, 1]} : vector<10x16x16xbf16> to vector<8x16x16xbf16>
    %11 = vector.shape_cast %10 : vector<8x16x16xbf16> to vector<128x16xbf16>
    %c1 = arith.constant 1 : index
    %c0_6 = arith.constant 0 : index
    %c0_7 = arith.constant 0 : index
    %12 = vector.load %arg3[%c1, %c0_6, %c0_7] : memref<9x16x128xbf16, #tpu.memory_space<vmem>>, vector<1x16x128xbf16>
    %13 = vector.shape_cast %12 : vector<1x16x128xbf16> to vector<16x128xbf16>
    %cst_8 = arith.constant dense<0.000000e+00> : vector<128x128xf32>
    %14 = tpu.matmul %11, %13, %cst_8 {dimension_numbers = #tpu.dot_dimension_numbers<[1], [0], [0], [1], [0, 0, 1, 1], [], []>} : vector<128x16xbf16>, vector<16x128xbf16>, vector<128x128xf32> -> vector<128x128xf32>
    %15 = arith.addf %9, %14 : vector<128x128xf32>
    %16 = vector.extract_strided_slice %4 {offsets = [0, 0, 0], sizes = [8, 16, 16], strides = [1, 1, 1]} : vector<10x16x16xbf16> to vector<8x16x16xbf16>
    %17 = vector.shape_cast %16 : vector<8x16x16xbf16> to vector<128x16xbf16>
    %c2 = arith.constant 2 : index
    %c0_9 = arith.constant 0 : index
    %c0_10 = arith.constant 0 : index
    %18 = vector.load %arg3[%c2, %c0_9, %c0_10] : memref<9x16x128xbf16, #tpu.memory_space<vmem>>, vector<1x16x128xbf16>
    %19 = vector.shape_cast %18 : vector<1x16x128xbf16> to vector<16x128xbf16>
    %cst_11 = arith.constant dense<0.000000e+00> : vector<128x128xf32>
    %20 = tpu.matmul %17, %19, %cst_11 {dimension_numbers = #tpu.dot_dimension_numbers<[1], [0], [0], [1], [0, 0, 1, 1], [], []>} : vector<128x16xbf16>, vector<16x128xbf16>, vector<128x128xf32> -> vector<128x128xf32>
    %21 = arith.addf %15, %20 : vector<128x128xf32>
    %22 = vector.extract_strided_slice %2 {offsets = [1, 0, 0], sizes = [8, 16, 16], strides = [1, 1, 1]} : vector<10x16x16xbf16> to vector<8x16x16xbf16>
    %23 = vector.shape_cast %22 : vector<8x16x16xbf16> to vector<128x16xbf16>
    %c3 = arith.constant 3 : index
    %c0_12 = arith.constant 0 : index
    %c0_13 = arith.constant 0 : index
    %24 = vector.load %arg3[%c3, %c0_12, %c0_13] : memref<9x16x128xbf16, #tpu.memory_space<vmem>>, vector<1x16x128xbf16>
    %25 = vector.shape_cast %24 : vector<1x16x128xbf16> to vector<16x128xbf16>
    %cst_14 = arith.constant dense<0.000000e+00> : vector<128x128xf32>
    %26 = tpu.matmul %23, %25, %cst_14 {dimension_numbers = #tpu.dot_dimension_numbers<[1], [0], [0], [1], [0, 0, 1, 1], [], []>} : vector<128x16xbf16>, vector<16x128xbf16>, vector<128x128xf32> -> vector<128x128xf32>
    %27 = arith.addf %21, %26 : vector<128x128xf32>
    %28 = vector.extract_strided_slice %3 {offsets = [1, 0, 0], sizes = [8, 16, 16], strides = [1, 1, 1]} : vector<10x16x16xbf16> to vector<8x16x16xbf16>
    %29 = vector.shape_cast %28 : vector<8x16x16xbf16> to vector<128x16xbf16>
    %c4 = arith.constant 4 : index
    %c0_15 = arith.constant 0 : index
    %c0_16 = arith.constant 0 : index
    %30 = vector.load %arg3[%c4, %c0_15, %c0_16] : memref<9x16x128xbf16, #tpu.memory_space<vmem>>, vector<1x16x128xbf16>
    %31 = vector.shape_cast %30 : vector<1x16x128xbf16> to vector<16x128xbf16>
    %cst_17 = arith.constant dense<0.000000e+00> : vector<128x128xf32>
    %32 = tpu.matmul %29, %31, %cst_17 {dimension_numbers = #tpu.dot_dimension_numbers<[1], [0], [0], [1], [0, 0, 1, 1], [], []>} : vector<128x16xbf16>, vector<16x128xbf16>, vector<128x128xf32> -> vector<128x128xf32>
    %33 = arith.addf %27, %32 : vector<128x128xf32>
    %34 = vector.extract_strided_slice %4 {offsets = [1, 0, 0], sizes = [8, 16, 16], strides = [1, 1, 1]} : vector<10x16x16xbf16> to vector<8x16x16xbf16>
    %35 = vector.shape_cast %34 : vector<8x16x16xbf16> to vector<128x16xbf16>
    %c5 = arith.constant 5 : index
    %c0_18 = arith.constant 0 : index
    %c0_19 = arith.constant 0 : index
    %36 = vector.load %arg3[%c5, %c0_18, %c0_19] : memref<9x16x128xbf16, #tpu.memory_space<vmem>>, vector<1x16x128xbf16>
    %37 = vector.shape_cast %36 : vector<1x16x128xbf16> to vector<16x128xbf16>
    %cst_20 = arith.constant dense<0.000000e+00> : vector<128x128xf32>
    %38 = tpu.matmul %35, %37, %cst_20 {dimension_numbers = #tpu.dot_dimension_numbers<[1], [0], [0], [1], [0, 0, 1, 1], [], []>} : vector<128x16xbf16>, vector<16x128xbf16>, vector<128x128xf32> -> vector<128x128xf32>
    %39 = arith.addf %33, %38 : vector<128x128xf32>
    %40 = vector.extract_strided_slice %2 {offsets = [2, 0, 0], sizes = [8, 16, 16], strides = [1, 1, 1]} : vector<10x16x16xbf16> to vector<8x16x16xbf16>
    %41 = vector.shape_cast %40 : vector<8x16x16xbf16> to vector<128x16xbf16>
    %c6 = arith.constant 6 : index
    %c0_21 = arith.constant 0 : index
    %c0_22 = arith.constant 0 : index
    %42 = vector.load %arg3[%c6, %c0_21, %c0_22] : memref<9x16x128xbf16, #tpu.memory_space<vmem>>, vector<1x16x128xbf16>
    %43 = vector.shape_cast %42 : vector<1x16x128xbf16> to vector<16x128xbf16>
    %cst_23 = arith.constant dense<0.000000e+00> : vector<128x128xf32>
    %44 = tpu.matmul %41, %43, %cst_23 {dimension_numbers = #tpu.dot_dimension_numbers<[1], [0], [0], [1], [0, 0, 1, 1], [], []>} : vector<128x16xbf16>, vector<16x128xbf16>, vector<128x128xf32> -> vector<128x128xf32>
    %45 = arith.addf %39, %44 : vector<128x128xf32>
    %46 = vector.extract_strided_slice %3 {offsets = [2, 0, 0], sizes = [8, 16, 16], strides = [1, 1, 1]} : vector<10x16x16xbf16> to vector<8x16x16xbf16>
    %47 = vector.shape_cast %46 : vector<8x16x16xbf16> to vector<128x16xbf16>
    %c7 = arith.constant 7 : index
    %c0_24 = arith.constant 0 : index
    %c0_25 = arith.constant 0 : index
    %48 = vector.load %arg3[%c7, %c0_24, %c0_25] : memref<9x16x128xbf16, #tpu.memory_space<vmem>>, vector<1x16x128xbf16>
    %49 = vector.shape_cast %48 : vector<1x16x128xbf16> to vector<16x128xbf16>
    %cst_26 = arith.constant dense<0.000000e+00> : vector<128x128xf32>
    %50 = tpu.matmul %47, %49, %cst_26 {dimension_numbers = #tpu.dot_dimension_numbers<[1], [0], [0], [1], [0, 0, 1, 1], [], []>} : vector<128x16xbf16>, vector<16x128xbf16>, vector<128x128xf32> -> vector<128x128xf32>
    %51 = arith.addf %45, %50 : vector<128x128xf32>
    %52 = vector.extract_strided_slice %4 {offsets = [2, 0, 0], sizes = [8, 16, 16], strides = [1, 1, 1]} : vector<10x16x16xbf16> to vector<8x16x16xbf16>
    %53 = vector.shape_cast %52 : vector<8x16x16xbf16> to vector<128x16xbf16>
    %c8 = arith.constant 8 : index
    %c0_27 = arith.constant 0 : index
    %c0_28 = arith.constant 0 : index
    %54 = vector.load %arg3[%c8, %c0_27, %c0_28] : memref<9x16x128xbf16, #tpu.memory_space<vmem>>, vector<1x16x128xbf16>
    %55 = vector.shape_cast %54 : vector<1x16x128xbf16> to vector<16x128xbf16>
    %cst_29 = arith.constant dense<0.000000e+00> : vector<128x128xf32>
    %56 = tpu.matmul %53, %55, %cst_29 {dimension_numbers = #tpu.dot_dimension_numbers<[1], [0], [0], [1], [0, 0, 1, 1], [], []>} : vector<128x16xbf16>, vector<16x128xbf16>, vector<128x128xf32> -> vector<128x128xf32>
    %57 = arith.addf %51, %56 : vector<128x128xf32>
    %c0_30 = arith.constant 0 : index
    %c0_31 = arith.constant 0 : index
    %58 = vector.load %arg4[%c0_30, %c0_31] : memref<1x128xf32, #tpu.memory_space<vmem>>, vector<1x128xf32>
    %59 = vector.broadcast %58 : vector<1x128xf32> to vector<128x128xf32>
    %60 = arith.addf %57, %59 : vector<128x128xf32>
    %cst_32 = arith.constant dense<0xFF800000> : vector<128xf32>
    %61 = vector.multi_reduction <maximumf>, %60, %cst_32 [1] : vector<128x128xf32> to vector<128xf32>
    %62 = vector.shape_cast %61 : vector<128xf32> to vector<128x1xf32>
    %63 = vector.broadcast %62 : vector<128x1xf32> to vector<128x128xf32>
    %64 = arith.subf %60, %63 : vector<128x128xf32>
    %65 = math.exp %64 : vector<128x128xf32>
    %c0_33 = arith.constant 0 : index
    %c0_34 = arith.constant 0 : index
    %c0_35 = arith.constant 0 : index
    %66 = vector.load %arg5[%c0_33, %c0_34, %c0_35] : memref<1x128x128xf32, #tpu.memory_space<vmem>>, vector<1x128x128xf32>
    %67 = vector.shape_cast %66 : vector<1x128x128xf32> to vector<128x128xf32>
    %cst_36 = arith.constant dense<0.000000e+00> : vector<128x128xf32>
    %68 = tpu.matmul %65, %67, %cst_36 {dimension_numbers = #tpu.dot_dimension_numbers<[1], [0], [0], [1], [0, 0, 1, 1], [], []>} : vector<128x128xf32>, vector<128x128xf32>, vector<128x128xf32> -> vector<128x128xf32>
    %69 = vector.extract_strided_slice %68 {offsets = [0, 0], sizes = [128, 1], strides = [1, 1]} : vector<128x128xf32> to vector<128x1xf32>
    %70 = vector.extract_strided_slice %68 {offsets = [0, 1], sizes = [128, 1], strides = [1, 1]} : vector<128x128xf32> to vector<128x1xf32>
    %71 = arith.divf %69, %70 : vector<128x1xf32>
    %72 = vector.shape_cast %71 : vector<128x1xf32> to vector<8x16xf32>
    %c0_37 = arith.constant 0 : index
    %c0_38 = arith.constant 0 : index
    %c0_39 = arith.constant 0 : index
    %73 = vector.load %arg6[%c0_37, %c0_38, %c0_39] : memref<1x8x16xf32, #tpu.memory_space<vmem>>, vector<1x8x16xf32>
    %74 = vector.shape_cast %73 : vector<1x8x16xf32> to vector<8x16xf32>
    %75 = vector.shape_cast %72 : vector<8x16xf32> to vector<1x8x16xf32>
    tpu.vector_store %arg6[%c0_37, %c0_38, %c0_39], %75 {strides = array<i32>} : memref<1x8x16xf32, #tpu.memory_space<vmem>>, vector<1x8x16xf32>,
    return
  }
  func.func @transform_0(%arg0: i32, %arg1: i32) -> (i32, i32, i32, i32) {
    %c2_i32 = arith.constant 2 : i32
    %0 = arith.muli %arg0, %c2_i32 : i32
    %1 = arith.addi %0, %arg1 : i32
    %c0_i32 = arith.constant 0 : i32
    %c0_i32_0 = arith.constant 0 : i32
    %c0_i32_1 = arith.constant 0 : i32
    %c0_i32_2 = arith.constant 0 : i32
    return %1, %c0_i32, %c0_i32_0, %c0_i32_1 : i32, i32, i32, i32
  }
  func.func @transform_1(%arg0: i32, %arg1: i32) -> (i32, i32, i32) {
    %c0_i32 = arith.constant 0 : i32
    %c0_i32_0 = arith.constant 0 : i32
    %c0_i32_1 = arith.constant 0 : i32
    %c0_i32_2 = arith.constant 0 : i32
    return %c0_i32, %c0_i32_0, %c0_i32_1 : i32, i32, i32
  }
  func.func @transform_2(%arg0: i32, %arg1: i32) -> (i32, i32) {
    %c0_i32 = arith.constant 0 : i32
    %c0_i32_0 = arith.constant 0 : i32
    %c0_i32_1 = arith.constant 0 : i32
    return %c0_i32, %c0_i32_0 : i32, i32
  }
  func.func @transform_3(%arg0: i32, %arg1: i32) -> (i32, i32, i32) {
    %c0_i32 = arith.constant 0 : i32
    %c0_i32_0 = arith.constant 0 : i32
    %c0_i32_1 = arith.constant 0 : i32
    return %arg0, %c0_i32, %c0_i32_0 : i32, i32, i32
  }
  func.func @transform_4(%arg0: i32, %arg1: i32) -> (i32, i32, i32) {
    %c0_i32 = arith.constant 0 : i32
    %c0_i32_0 = arith.constant 0 : i32
    return %arg0, %arg1, %c0_i32 : i32, i32, i32
  }
}

</mosaic_0001>

<bundles_post_ra>
// kernel: disp_head_forward.1
= control target key start
LH: loop header
LB: loop body
LE: loop exit
PB: predicated region body
PF: predicated region fallthrough
CT: control target
= control target key end

     0   :  { %s3163_s15 = smov 0   ;;  %s3165_s16 = smov 0   ;;  %s4154_s0 = inlined_call_operand.vmem [shape: bf16[4,10,18,16], index: 0, kind: input, shape index: {}]   ;;  %s4155_s1 = inlined_call_operand.vmem [shape: bf16[9,16,128], index: 1, kind: input, shape index: {}]   ;;  %s4156_s2 = inlined_call_operand.vmem [shape: f32[1,128], index: 2, kind: input, shape index: {}]   ;;  %s4157_s3 = inlined_call_operand.vmem [shape: f32[2,128,128], index: 3, kind: input, shape index: {}]   ;;  %s4158_s4 = inlined_call_operand.vmem [shape: f32[2,16,16], index: 4, kind: output, shape index: {}]  }
   0x1   :  { %s3167_s17 = smov 0   ;;  %s3169_s18 = smov 0  }
   0x2   :  { %s3171_s19 = smov 0  }
   0x3 LB: > { %s23_s20 = sadd.s32 1, %s3126_s17  ;;  %s26_s21 = sadd.s32 1, %s3130_s18  ;;  %s3134_s19 = sphi %s3171_s19, %s14_s19   ;;  %s3130_s18 = sphi %s3169_s18, %s4220_s18   ;;  %s3126_s17 = sphi %s3167_s17, %s4219_s17   ;;  %s3122_s16 = sphi %s3165_s16, %s4218_s16   ;;  %s3118_s15 = sphi %s3163_s15, %s4217_s15  }
   0x4   : > { %p24_p0 = scmp.ge.s32.totalorder %s23_s20, 2  ;;  %p2489_p1 = scmp.ge.s32.totalorder %s3134_s19, 1 }
   0x5   : > { %p194_p2 = scmp.lt.s32.totalorder %s3134_s19, 5 }
   0x6   : > { %s4222_s20 = smov (%p24_p0, %s23_s20), 0  ;;  %s4224_s21 = smov (!%p24_p0, %s26_s21), %s3130_s18 }
   0x7   : > { %p195_p3 = pnand %p2489_p1, %p194_p2  ;;  %p28_p4 = scmp.ge.s32.totalorder %s4224_s21, 2 }
   0x9   : > { %s4226_s21 = smov (%p28_p4, %s4224_s21), 0  ;;  %198 = sbr.rel (%p195_p3) target bundleno = 1013 (0x3f5), region = 36 }
   0xe   : > { %v3013_v0 = vld [vmem:[%s4155_s1 + $0x8] sm:$0xff]   ;;  %s2490_s24 = sshll.u32 %s3122_s16, 1  ;;  %v3014_v1 = vld [vmem:[%s4155_s1] sm:$0xff]   ;;  %v3208_v2 = vld [vmem:[%s4155_s1 + $0x10] sm:$0xff]   ;;  %vm513_vm0 = vcmask 130048   ;;  %vm810_vm4 = vcmask 1042432  }
   0xf   : > { %s231_s27 = sadd.s32 %s3118_s15, %s2490_s24  ;;  %2750 = vmatprep.subr.bf16.mxu0 %v3013_v0  ;;  %2768 = vmatprep.subr.bf16.mxu1 %v3014_v1  ;;  %v3024_v3 = vld [vmem:[%s4155_s1 + $0x18] sm:$0xff]   ;;  %vm285_vm1 = vsmask.f32 3328  ;;  %vm286_vm2 = vsmask.f32 7440  ;;  %v3273_v42 = vld [vmem:[%s4155_s1 + $0x28] sm:$0xff]  }
  0x10   : > { %p232_p5 = scmp.lt.s32.totalorder %s231_s27, 3  ;;  %2751 = vmatpush3.bf16.msra.mxu0 %v3013_v0  ;;  %2769 = vmatpush3.bf16.msra.mxu1 %v3014_v1  ;;  %vm3255_vm3 = vmor %vm285_vm1, %vm286_vm2  ;;  %vm811_vm5 = vcmask 1046532   ;;  %p239_p6 = scmp.lt.s32.totalorder %s3122_s16, 1  ;;  %vm2310_vm7 = vcmask 130112   ;;  %vm2375_vm8 = vcmask 1041409   ;;  %vm2377_vm9 = vcmask 1042434  }
  0x11   : > { %2786 = vmatprep.subr.bf16.mxu0 %v3208_v2  ;;  %2804 = vmatprep.subr.bf16.mxu1 %v3024_v3  ;;  %vm3443_vm6 = vmor %vm810_vm4, %vm811_vm5  ;;  %s3136_s7 = smov 127   ;;  %p246_p7 = scmp.lt.s32.totalorder %s3118_s15, 1  ;;  %vm2379_vm10 = vcmask 1043459   ;;  %vm2381_vm11 = vcmask 1044484   ;;  %vm2383_vm12 = vcmask 1045509   ;;  %vm2385_vm13 = vcmask 1046534  }
  0x12   : > { %s4228_s27 = smov (!%p232_p5, %s231_s27), 3  ;;  %s4230_s16 = smov (!%p239_p6, %s3122_s16), 1  ;;  %vm2387_vm14 = vcmask 1047559  }
  0x13   : > { %s2968_s6 = smul.u32 120, %s4228_s27  ;;  %s2636_s27 = sshll.u32 %s4230_s16, 7 }
  0x14   : > { %s3757_s30 = scalar_lea.vmem %s4157_s3, %s2636_s27  ;;  %s4232_s15 = smov (!%p246_p7, %s3118_s15), 1 }
  0x15   : > { %s3217_s9 = scalar_lea.vmem %s4154_s0, %s2968_s6  ;;  %s2494_s8 = sshll.u32 %s4230_s16, 1 }
  0x16   : > { %v3220_v4 = vld [vmem:[%s3217_s9] sm:$0xf]  ;;  %v3223_v5 = vld [vmem:[%s3217_s9 + $0x4] sm:$0xf]  ;;  %v3226_v6 = vld [vmem:[%s3217_s9 + $0x8] sm:$0x1] }
  0x17   : > { %v289_v7 = vshrl.u32 %v3220_v4, 16  ;;  %v292_v8 = vshll.u32 %v3220_v4, 16  ;;  %v298_v9 = vshll.u32 %v3223_v5, 16  ;;  %v302_v10 = vshrl.u32 %v3223_v5, 16  ;;  %v3233_v11 = vld [vmem:[%s3217_s9 + $0xc] sm:$0xf] }
  0x18   : > { %v308_v12 = vshll.u32 %v3226_v6, 16  ;;  %v2515_v13 = vcombine.low %v3220_v4, %v3223_v5  ;;  %v3239_v14 = vld [vmem:[%s3217_s9 + $0x10] sm:$0xf]  ;;  %v3242_v15 = vld [vmem:[%s3217_s9 + $0x14] sm:$0x1]  ;;  %v313_v21 = vshrl.u32 %v3233_v11, 16 }
  0x19   : > { %v291_v16 = vrot.slane %v289_v7, 4  ;;  %v294_v17 = vrot.slane %v292_v8, 5  ;;  %v300_v18 = vrot.slane %v298_v9, 5  ;;  %v304_v19 = vrot.slane %v302_v10, 4  ;;  %v3251_v28 = vld [vmem:[%s3217_s9 + $0x18] sm:$0xf] }
  0x1a   : > { %v310_v20 = vrot.slane %v308_v12, 5  ;;  %2770 = vmatprep.mubr.msk.bf16.mxu1 %vm513_vm0, %v2515_v13  ;;  %v316_v22 = vshll.u32 %v3233_v11, 16  ;;  %v322_v23 = vshll.u32 %v3239_v14, 16  ;;  %v326_v26 = vshrl.u32 %v3239_v14, 16  ;;  %v3260_v36 = vld [vmem:[%s3217_s9 + $0x1c] sm:$0xf] }
  0x1b   : > { %v295_v24 = vor.u32 %v294_v17, %v291_v16  ;;  %v305_v25 = vor.u32 %v304_v19, %v300_v18  ;;  %v332_v27 = vshll.u32 %v3242_v15, 16  ;;  %v315_v30 = vrot.slane %v313_v21, 4  ;;  %v3267_v40 = vld [vmem:[%s3217_s9 + $0x20] sm:$0x1]  ;;  %v3281_v47 = vld [vmem:[%s3217_s9 + $0x24] sm:$0xf] }
  0x1c   : > { %v318_v31 = vrot.slane %v316_v22, 5  ;;  %v324_v32 = vrot.slane %v322_v23, 5  ;;  %v328_v35 = vrot.slane %v326_v26, 4  ;;  %v3264_v39 = vcombine.low %v3233_v11, %v3239_v14  ;;  %v3289_v56 = vld [vmem:[%s3217_s9 + $0x28] sm:$0xf]  ;;  %v3317_v12 = vld [vmem:[%s4155_s1 + $0x20] sm:$0xff]  }
  0x1d   : > { %v296_v33 = vrot.slane %v295_v24, 4  ;;  %v306_v34 = vrot.slane %v305_v25, 4  ;;  %v334_v38 = vrot.slane %v332_v27, 5  ;;  %v337_v41 = vshrl.u32 %v3251_v28, 16  ;;  %v3299_v60 = vld [vmem:[%s3217_s9 + $0x2c] sm:$0x1] }
  0x1e   : > { %v319_v37 = vor.u32 %v318_v31, %v315_v30  ;;  %v329_v45 = vor.u32 %v328_v35, %v324_v32  ;;  %v340_v46 = vshll.u32 %v3251_v28, 16  ;;  %2771 = vmatmul.mubr.msk.bf16.vlgmr.msra.gmra.mxu1 %vm513_vm0, %v3264_v39  ;;  %v346_v51 = vshll.u32 %v3260_v36, 16  ;;  %v3322_v19 = vld [vmem:[%s3217_s9 + $0x34] sm:$0xf]  ;;  %v3331_v23 = vld [vmem:[%s3217_s9 + $0x38] sm:$0x1] }
  0x1f   : > { %v301_v43 = vsel %vm3255_vm3, %v296_v33, %v300_v18  ;;  %v311_v44 = vsel %vm3255_vm3, %v306_v34, %v310_v20  ;;  %v339_v50 = vrot.slane %v337_v41, 4  ;;  %v350_v54 = vshrl.u32 %v3260_v36, 16  ;;  %2805 = vmatpush3.bf16.msra.mxu1 %v3024_v3  ;;  %v3306_v3 = vld [vmem:[%s3217_s9 + $0x30] sm:$0xf]  ;;  %v3342_v35 = vld [vmem:[%s3217_s9 + $0x3c] sm:$0xf] }
  0x20   : > { %v2498_v48 = vcombine.low %v301_v43, %v311_v44  ;;  %v320_v49 = vrot.slane %v319_v37, 4  ;;  %v330_v52 = vrot.slane %v329_v45, 4  ;;  %v342_v53 = vrot.slane %v340_v46, 5  ;;  %2840 = vmatprep.subr.bf16.mxu1 %v3273_v42 }
  0x21   : > { %v356_v55 = vshll.u32 %v3267_v40, 16  ;;  %v348_v58 = vrot.slane %v346_v51, 5  ;;  %v3296_v59 = vcombine.low %v3251_v28, %v3260_v36  ;;  %v361_v61 = vshrl.u32 %v3281_v47, 16 }
  0x22   : > { %2752 = vmatprep.mubr.msk.bf16.mxu0 %vm513_vm0, %v2498_v48  ;;  %v325_v57 = vsel %vm3255_vm3, %v320_v49, %v324_v32  ;;  %v335_v62 = vsel %vm3255_vm3, %v330_v52, %v334_v38  ;;  %v343_v63 = vor.u32 %v342_v53, %v339_v50  ;;  %v352_v0 = vrot.slane %v350_v54, 4  ;;  %v3352_v48 = vld [vmem:[%s3217_s9 + $0x40] sm:$0xf] }
  0x23   : > { %v358_v1 = vrot.slane %v356_v55, 5  ;;  %v3308_v7 = vcombine.low %v325_v57, %v335_v62  ;;  %2774 = vmatprep.mubr.msk.bf16.mxu1 %vm513_vm0, %v3296_v59  ;;  %v363_v8 = vrot.slane %v361_v61, 4  ;;  %v364_v9 = vshll.u32 %v3281_v47, 16  ;;  %v3363_v55 = vld [vmem:[%s3217_s9 + $0x44] sm:$0x1] }
  0x24   : > { %v370_v10 = vshll.u32 %v3289_v56, 16  ;;  %v344_v13 = vrot.slane %v343_v63, 4  ;;  %v353_v16 = vor.u32 %v352_v0, %v348_v58  ;;  %v374_v17 = vshrl.u32 %v3289_v56, 16 }
  0x25   : > { %v380_v18 = vshll.u32 %v3299_v60, 16  ;;  %2753 = vmatmul.mubr.msk.bf16.vlgmr.msra.gmra.mxu0 %vm513_vm0, %v3308_v7  ;;  %v366_v20 = vrot.slane %v364_v9, 5  ;;  %v3328_v22 = vcombine.low %v3281_v47, %v3289_v56  ;;  %v385_v24 = vshrl.u32 %v3306_v3, 16 }
  0x26   : > { %v372_v21 = vrot.slane %v370_v10, 5  ;;  %2787 = vmatpush3.bf16.msra.mxu0 %v3208_v2  ;;  %v349_v25 = vsel %vm3255_vm3, %v344_v13, %v348_v58  ;;  %v354_v26 = vrot.slane %v353_v16, 4  ;;  %v376_v27 = vrot.slane %v374_v17, 4 }
  0x27   : > { %v382_v30 = vrot.slane %v380_v18, 5  ;;  %v367_v31 = vor.u32 %v366_v20, %v363_v8  ;;  %2775 = vmatmul.mubr.msk.bf16.gmra.mxu1 %vm513_vm0, %v3328_v22  ;;  %v387_v32 = vrot.slane %v385_v24, 4  ;;  %v388_v33 = vshll.u32 %v3306_v3, 16  ;;  %2822 = vmatprep.subr.bf16.mxu0 %v3317_v12 }
  0x28   : > { %v394_v34 = vshll.u32 %v3322_v19, 16  ;;  %v359_v2 = vsel %vm3255_vm3, %v354_v26, %v358_v1  ;;  %v377_v37 = vor.u32 %v376_v27, %v372_v21  ;;  %v398_v38 = vshrl.u32 %v3322_v19, 16  ;;  %v3374_v1 = vld [vmem:[%s3217_s9 + $0x48] sm:$0xf]  ;;  %v3391_v27 = vld [vmem:[%s3217_s9 + $0x50] sm:$0x1] }
  0x29   : > { %v404_v41 = vshll.u32 %v3331_v23, 16  ;;  %v3349_v43 = vcombine.low %v349_v25, %v359_v2  ;;  %v368_v44 = vrot.slane %v367_v31, 4  ;;  %v390_v45 = vrot.slane %v388_v33, 5  ;;  %v3398_v2 = vld [vmem:[%s3217_s9 + $0x54] sm:$0xf] }
  0x2a   : > { %v396_v46 = vrot.slane %v394_v34, 5  ;;  %v378_v49 = vrot.slane %v377_v37, 4  ;;  %v400_v50 = vrot.slane %v398_v38, 4  ;;  %v3356_v52 = vcombine.low %v3306_v3, %v3322_v19 }
  0x2b   : > { %v406_v51 = vrot.slane %v404_v41, 5  ;;  %2756 = vmatprep.mubr.msk.bf16.mxu0 %vm513_vm0, %v3349_v43  ;;  %v373_v53 = vsel %vm3255_vm3, %v368_v44, %v372_v21  ;;  %v391_v54 = vor.u32 %v390_v45, %v387_v32  ;;  %v409_v57 = vshrl.u32 %v3342_v35, 16  ;;  %v3380_v21 = vld [vmem:[%s3217_s9 + $0x4c] sm:$0xf] }
  0x2c   : > { %v412_v58 = vshll.u32 %v3342_v35, 16  ;;  %v383_v61 = vsel %vm3255_vm3, %v378_v49, %v382_v30  ;;  %v401_v62 = vor.u32 %v400_v50, %v396_v46  ;;  %2778 = vmatprep.mubr.msk.bf16.mxu1 %vm513_vm0, %v3356_v52  ;;  %v418_v63 = vshll.u32 %v3352_v48, 16 }
  0x2d   : > { %v422_v0 = vshrl.u32 %v3352_v48, 16  ;;  %v3376_v8 = vcombine.low %v373_v53, %v383_v61  ;;  %v392_v9 = vrot.slane %v391_v54, 4  ;;  %v411_v10 = vrot.slane %v409_v57, 4 }
  0x2e   : > { %v414_v13 = vrot.slane %v412_v58, 5  ;;  %v402_v16 = vrot.slane %v401_v62, 4  ;;  %v420_v17 = vrot.slane %v418_v63, 5  ;;  %v428_v20 = vshll.u32 %v3363_v55, 16  ;;  %v3419_v58 = vld [vmem:[%s3217_s9 + $0x5c] sm:$0x1] }
  0x2f   : > { %v424_v18 = vrot.slane %v422_v0, 4  ;;  %2757 = vmatmul.mubr.msk.bf16.gmra.mxu0 %vm513_vm0, %v3376_v8  ;;  %v397_v24 = vsel %vm3255_vm3, %v392_v9, %v396_v46  ;;  %v3388_v26 = vcombine.low %v3342_v35, %v3352_v48  ;;  %v433_v30 = vshrl.u32 %v3374_v1, 16 }
  0x30   : > { %v415_v25 = vor.u32 %v414_v13, %v411_v10  ;;  %v407_v31 = vsel %vm3255_vm3, %v402_v16, %v406_v51  ;;  %v430_v33 = vrot.slane %v428_v20, 5  ;;  %v436_v34 = vshll.u32 %v3374_v1, 16  ;;  %v3408_v51 = vld [vmem:[%s3217_s9 + $0x58] sm:$0xf] }
  0x31   : > { %v425_v32 = vor.u32 %v424_v18, %v420_v17  ;;  %v3400_v37 = vcombine.low %v397_v24, %v407_v31  ;;  %2779 = vmatmul.mubr.msk.bf16.gmra.mxu1 %vm513_vm0, %v3388_v26  ;;  %v435_v41 = vrot.slane %v433_v30, 4  ;;  %v442_v44 = vshll.u32 %v3380_v21, 16 }
  0x32   : > { %v416_v38 = vrot.slane %v415_v25, 4  ;;  %v438_v46 = vrot.slane %v436_v34, 5  ;;  %v446_v49 = vshrl.u32 %v3380_v21, 16  ;;  %v452_v50 = vshll.u32 %v3391_v27, 16 }
  0x33   : > { %v426_v45 = vrot.slane %v425_v32, 4  ;;  %2760 = vmatprep.mubr.msk.bf16.mxu0 %vm513_vm0, %v3400_v37  ;;  %v444_v54 = vrot.slane %v442_v44, 5  ;;  %v3416_v57 = vcombine.low %v3374_v1, %v3380_v21  ;;  %v457_v61 = vshrl.u32 %v3398_v2, 16 }
  0x34   : > { %v421_v53 = vsel %vm3255_vm3, %v416_v38, %v420_v17  ;;  %v439_v63 = vor.u32 %v438_v46, %v435_v41  ;;  %v448_v0 = vrot.slane %v446_v49, 4  ;;  %v454_v9 = vrot.slane %v452_v50, 5 }
  0x35   : > { %v431_v62 = vsel %vm3255_vm3, %v426_v45, %v430_v33  ;;  %2782 = vmatprep.mubr.msk.bf16.mxu1 %vm513_vm0, %v3416_v57  ;;  %v459_v13 = vrot.slane %v457_v61, 4  ;;  %v460_v16 = vshll.u32 %v3398_v2, 16  ;;  %v466_v17 = vshll.u32 %v3408_v51, 16 }
  0x36   : > { %v3424_v10 = vcombine.low %v421_v53, %v431_v62  ;;  %v440_v18 = vrot.slane %v439_v63, 4  ;;  %v449_v20 = vor.u32 %v448_v0, %v444_v54  ;;  %v470_v24 = vshrl.u32 %v3408_v51, 16 }
  0x37   : > { %v476_v25 = vshll.u32 %v3419_v58, 16  ;;  %v462_v30 = vrot.slane %v460_v16, 5  ;;  %v468_v31 = vrot.slane %v466_v17, 5  ;;  %v3436_v32 = vcombine.low %v3398_v2, %v3408_v51 }
  0x38   : > { %2761 = vmatmul.mubr.msk.bf16.gmra.mxu0 %vm513_vm0, %v3424_v10  ;;  %v2532_v33 = vrot.slane %v3220_v4, 9  ;;  %v445_v34 = vsel %vm3255_vm3, %v440_v18, %v444_v54  ;;  %v450_v38 = vrot.slane %v449_v20, 4  ;;  %v472_v41 = vrot.slane %v470_v24, 4 }
  0x39   : > { %v818_v45 = vrot.slane %v3226_v6, 5  ;;  %v822_v46 = vrot.slane %v3239_v14, 5  ;;  %v463_v49 = vor.u32 %v462_v30, %v459_v13  ;;  %2783 = vmatmul.mubr.msk.bf16.gmra.mxu1 %vm513_vm0, %v3436_v32  ;;  %v815_v4 = vrot.slane %v3223_v5, 5 }
  0x3a   : > { %v455_v50 = vsel %vm3255_vm3, %v450_v38, %v454_v9  ;;  %v473_v53 = vor.u32 %v472_v41, %v468_v31  ;;  %v478_v54 = vrot.slane %v476_v25, 5  ;;  %2806 = vmatprep.mubr.msk.bf16.mxu1 %vm513_vm0, %v3264_v39  ;;  %v829_v61 = vrot.slane %v3260_v36, 5 }
  0x3b   : > { %v3457_v62 = vcombine.low %v445_v34, %v455_v50  ;;  %v464_v6 = vrot.slane %v463_v49, 4  ;;  %v816_v14 = vsel %vm3443_vm6, %v2532_v33, %v815_v4  ;;  %v817_v63 = vrot.slane %v815_v4, 4  ;;  %v3506_v49 = vld [vmem:[%s3217_s9 + $0x60] sm:$0xf]  ;;  %v3513_v50 = vld [vmem:[%s3217_s9 + $0x64] sm:$0xf] }
  0x3c   : > { %v474_v0 = vrot.slane %v473_v53, 4  ;;  %v825_v5 = vrot.slane %v3242_v15, 5  ;;  %v2533_v16 = vrot.slane %v3233_v11, 9  ;;  %v824_v17 = vrot.slane %v822_v46, 4 }
  0x3d   : > { %2764 = vmatprep.mubr.msk.bf16.mxu0 %vm513_vm0, %v3457_v62  ;;  %v469_v9 = vsel %vm3255_vm3, %v464_v6, %v468_v31  ;;  %v819_v39 = vsel %vm3443_vm6, %v817_v63, %v818_v45  ;;  %v2534_v15 = vrot.slane %v3251_v28, 9  ;;  %v831_v20 = vrot.slane %v829_v61, 4  ;;  %v3480_v31 = vld [vmem:[%s4155_s1 + $0x38] sm:$0xff]  }
  0x3e   : > { %v479_v36 = vsel %vm3255_vm3, %v474_v0, %v478_v54  ;;  %v2542_v13 = vcombine.low %v816_v14, %v819_v39  ;;  %v832_v24 = vrot.slane %v3267_v40, 5  ;;  %v836_v25 = vrot.slane %v3289_v56, 5  ;;  %v3541_v39 = vld [vmem:[%s3217_s9 + $0x6c] sm:$0xf] }
  0x3f   : > { %v3471_v18 = vcombine.low %v469_v9, %v479_v36  ;;  %v843_v30 = vrot.slane %v3322_v19, 5  ;;  %v823_v11 = vsel %vm3443_vm6, %v2533_v16, %v822_v46  ;;  %v826_v28 = vsel %vm3443_vm6, %v824_v17, %v825_v5 }
  0x40   : > { %v830_v40 = vsel %vm3443_vm6, %v2534_v15, %v829_v61  ;;  %v833_v56 = vsel %vm3443_vm6, %v831_v20, %v832_v24  ;;  %v2535_v19 = vrot.slane %v3281_v47, 9  ;;  %v839_v33 = vrot.slane %v3299_v60, 5  ;;  %v3549_v15 = vld [vmem:[%s3217_s9 + $0x70] sm:$0xf] }
  0x41   : > { %2765 = vmatmul.mubr.msk.bf16.gmra.mxu0 %vm513_vm0, %v3471_v18  ;;  %2807 = vmatmul.mubr.msk.bf16.vlgmr.msra.gmra.mxu1 %vm513_vm0, %v3296_v59  ;;  %v838_v34 = vrot.slane %v836_v25, 4  ;;  %v2536_v38 = vrot.slane %v3306_v3, 9  ;;  %v845_v41 = vrot.slane %v843_v30, 4  ;;  %v846_v45 = vrot.slane %v3331_v23, 5 }
  0x42   : > { %2788 = vmatprep.mubr.msk.bf16.mxu0 %vm513_vm0, %v2542_v13  ;;  %2810 = vmatprep.mubr.msk.bf16.mxu1 %vm513_vm0, %v3328_v22  ;;  %v3503_v46 = vcombine.low %v823_v11, %v826_v28  ;;  %v3508_v4 = vcombine.low %v830_v40, %v833_v56  ;;  %v2537_v47 = vrot.slane %v3342_v35, 9  ;;  %v850_v60 = vrot.slane %v3352_v48, 5  ;;  %v3526_v35 = vld [vmem:[%s4155_s1 + $0x30] sm:$0xff]  }
  0x43   : > { %2841 = vmatpush3.bf16.msra.mxu1 %v3273_v42  ;;  %v3516_v42 = vld [vmem:[%s3217_s9 + $0x68] sm:$0x1]  ;;  %v837_v3 = vsel %vm3443_vm6, %v2535_v19, %v836_v25  ;;  %v1170_v23 = vshrl.u32 %v3506_v49, 16  ;;  %v1173_v53 = vshll.u32 %v3506_v49, 16  ;;  %v1183_v54 = vshrl.u32 %v3513_v50, 16 }
  0x44   : > { %2876 = vmatprep.subr.bf16.mxu1 %v3480_v31  ;;  %v840_v48 = vsel %vm3443_vm6, %v838_v34, %v839_v33  ;;  %v844_v61 = vsel %vm3443_vm6, %v2536_v38, %v843_v30  ;;  %v847_v6 = vsel %vm3443_vm6, %v845_v41, %v846_v45  ;;  %v1179_v14 = vshll.u32 %v3513_v50, 16  ;;  %v282_v30 = vld [vmem:[%s3217_s9 + $0x74] sm:$0x1]  ;;  %s249_s9 = sadd.s32 %s2494_s8, %s4232_s15 }
  0x45   : > { %v1172_v63 = vrot.slane %v1170_v23, 4  ;;  %v1175_v0 = vrot.slane %v1173_v53, 5  ;;  %v1185_v5 = vrot.slane %v1183_v54, 4  ;;  %v1189_v9 = vshll.u32 %v3516_v42, 16  ;;  %s2495_s16 = sshll.u32 %s249_s9, 3 }
  0x46   : > { %v852_v36 = vrot.slane %v850_v60, 4  ;;  %v853_v13 = vrot.slane %v3363_v55, 5  ;;  %v2538_v16 = vrot.slane %v3374_v1, 9  ;;  %v1181_v17 = vrot.slane %v1179_v14, 5  ;;  %s251_s11 = scalar_lea.vmem %s4158_s4, %s2495_s16 }
  0x47   : > { %v3551_v20 = vcombine.low %v837_v3, %v840_v48  ;;  %v851_v24 = vsel %vm3443_vm6, %v2537_v47, %v850_v60  ;;  %v1176_v25 = vor.u32 %v1175_v0, %v1172_v63  ;;  %v3560_v55 = vcombine.low %v844_v61, %v847_v6 }
  0x48   : > { %v860_v1 = vrot.slane %v3391_v27, 5  ;;  %v1186_v11 = vor.u32 %v1185_v5, %v1181_v17  ;;  %v1191_v28 = vrot.slane %v1189_v9, 5  ;;  %v1588_v56 = vshrl.u32 %v3541_v39, 16 }
  0x49   : > { %2789 = vmatmul.mubr.msk.bf16.vlgmr.msra.gmra.mxu0 %vm513_vm0, %v3503_v46  ;;  %2811 = vmatmul.mubr.msk.bf16.gmra.mxu1 %vm513_vm0, %v3356_v52  ;;  %v1177_v40 = vrot.slane %v1176_v25, 4  ;;  %v1591_v19 = vshll.u32 %v3541_v39, 16  ;;  %v1601_v33 = vshrl.u32 %v3549_v15, 16  ;;  %v1597_v38 = vshll.u32 %v3549_v15, 16 }
  0x4a   : > { %2823 = vmatpush3.bf16.msra.mxu0 %v3317_v12  ;;  %2792 = vmatprep.mubr.msk.bf16.mxu0 %vm513_vm0, %v3508_v4  ;;  %v857_v12 = vrot.slane %v3380_v21, 5  ;;  %v854_v21 = vsel %vm3443_vm6, %v852_v36, %v853_v13  ;;  %v1187_v34 = vrot.slane %v1186_v11, 4  ;;  %v1607_v41 = vshll.u32 %v282_v30, 16 }
  0x4b   : > { %2814 = vmatprep.mubr.msk.bf16.mxu1 %vm513_vm0, %v3388_v26  ;;  %2858 = vmatprep.subr.bf16.mxu0 %v3526_v35  ;;  %v1182_v27 = vsel %vm3255_vm3, %v1177_v40, %v1181_v17  ;;  %v1590_v47 = vrot.slane %v1588_v56, 4  ;;  %v1593_v60 = vrot.slane %v1591_v19, 5  ;;  %v1599_v53 = vrot.slane %v1597_v38, 5 }
  0x4c   : > { %v859_v45 = vrot.slane %v857_v12, 4  ;;  %v858_v3 = vsel %vm3443_vm6, %v2538_v16, %v857_v12  ;;  %v1192_v23 = vsel %vm3255_vm3, %v1187_v34, %v1191_v28  ;;  %v1603_v54 = vrot.slane %v1601_v33, 4 }
  0x4d   : > { %v3579_v48 = vcombine.low %v1182_v27, %v1192_v23  ;;  %v1594_v61 = vor.u32 %v1593_v60, %v1590_v47  ;;  %v2620_v6 = vrot.slane %v3541_v39, 9  ;;  %v1742_v14 = vrot.slane %v3549_v15, 5 }
  0x4e   : > { %v864_v63 = vrot.slane %v3408_v51, 5  ;;  %v1604_v0 = vor.u32 %v1603_v54, %v1599_v53  ;;  %v1609_v5 = vrot.slane %v1607_v41, 5  ;;  %v1745_v9 = vrot.slane %v282_v30, 5 }
  0x4f   : > { %v861_v36 = vsel %vm3443_vm6, %v859_v45, %v860_v1  ;;  %v1595_v13 = vrot.slane %v1594_v61, 4  ;;  %v3592_v16 = vsel %vm3443_vm6, %v2620_v6, %v1742_v14  ;;  %v1744_v17 = vrot.slane %v1742_v14, 4 }
  0x50   : > { %v3594_v12 = vcombine.low %v851_v24, %v854_v21  ;;  %v2539_v25 = vrot.slane %v3398_v2, 9  ;;  %v1605_v51 = vrot.slane %v1604_v0, 4  ;;  %v867_v11 = vrot.slane %v3419_v58, 5  ;;  %v3030_v21 = vld [vmem:[%s4155_s1 + $0x40] sm:$0xff]  }
  0x51   : > { %2793 = vmatmul.mubr.msk.bf16.gmra.mxu0 %vm513_vm0, %v3551_v20  ;;  %2815 = vmatmul.mubr.msk.bf16.gmra.mxu1 %vm513_vm0, %v3416_v57  ;;  %v2561_v28 = vcombine.low %v3506_v49, %v3513_v50  ;;  %v1600_v30 = vsel %vm3255_vm3, %v1595_v13, %v1599_v53  ;;  %v3604_v1 = vsel %vm3443_vm6, %v1744_v17, %v1745_v9  ;;  %v866_v56 = vrot.slane %v864_v63, 4 }
  0x52   : > { %2796 = vmatprep.mubr.msk.bf16.mxu0 %vm513_vm0, %v3560_v55  ;;  %2818 = vmatprep.mubr.msk.bf16.mxu1 %vm513_vm0, %v3436_v32  ;;  %v2548_v40 = vcombine.low %v858_v3, %v861_v36  ;;  %v1610_v24 = vsel %vm3255_vm3, %v1605_v51, %v1609_v5  ;;  %v2623_v2 = vcombine.low %v3592_v16, %v3604_v1  ;;  %v1327_v34 = vrot.slane %v3516_v42, 5 }
  0x53   : > { %v2610_v19 = vcombine.low %v1600_v30, %v1610_v24  ;;  %v865_v58 = vsel %vm3443_vm6, %v2539_v25, %v864_v63  ;;  %v868_v33 = vsel %vm3443_vm6, %v866_v56, %v867_v11 }
  0x54   : > { %v2549_v29 = vcombine.low %v865_v58, %v868_v33 }
  0x59   : > { %2797 = vmatmul.mubr.msk.bf16.gmra.mxu0 %vm513_vm0, %v3594_v12  ;;  %2819 = vmatmul.mubr.msk.bf16.gmra.mxu1 %vm513_vm0, %v2561_v28 }
  0x5a   : > { %2800 = vmatprep.mubr.msk.bf16.mxu0 %vm513_vm0, %v2548_v40  ;;  %2842 = vmatprep.mubr.msk.bf16.mxu1 %vm513_vm0, %v3503_v46 }
  0x61   : > { %2801 = vmatmul.mubr.msk.bf16.gmra.mxu0 %vm513_vm0, %v2549_v29  ;;  %2843 = vmatmul.mubr.msk.bf16.vlgmr.msra.gmra.mxu1 %vm513_vm0, %v3508_v4 }
  0x62   : > { %2824 = vmatprep.mubr.msk.bf16.mxu0 %vm513_vm0, %v3308_v7  ;;  %2846 = vmatprep.mubr.msk.bf16.mxu1 %vm513_vm0, %v3551_v20  ;;  %v1324_v7 = vrot.slane %v3513_v50, 5 }
  0x63   : > { %2877 = vmatpush3.bf16.msra.mxu1 %v3480_v31  ;;  %v2583_v31 = vrot.slane %v3506_v49, 9 }
  0x64   : > { %v1326_v46 = vrot.slane %v1324_v7, 4 }
  0x65   : > { %v1325_v50 = vsel %vm3443_vm6, %v2583_v31, %v1324_v7 }
  0x69   : > { %2825 = vmatmul.mubr.msk.bf16.vlgmr.msra.gmra.mxu0 %vm513_vm0, %v3349_v43  ;;  %2847 = vmatmul.mubr.msk.bf16.gmra.mxu1 %vm513_vm0, %v3560_v55 }
  0x6a   : > { %2859 = vmatpush3.bf16.msra.mxu0 %v3526_v35  ;;  %2828 = vmatprep.mubr.msk.bf16.mxu0 %vm513_vm0, %v3376_v8  ;;  %v1328_v35 = vsel %vm3443_vm6, %v1326_v46, %v1327_v34 }
  0x6b   : > { %2850 = vmatprep.mubr.msk.bf16.mxu1 %vm513_vm0, %v3594_v12  ;;  %2894 = vmatprep.subr.bf16.mxu0 %v3030_v21  ;;  %v2586_v49 = vcombine.low %v1325_v50, %v1328_v35 }
  0x71   : > { %2829 = vmatmul.mubr.msk.bf16.gmra.mxu0 %vm513_vm0, %v3400_v37  ;;  %2851 = vmatmul.mubr.msk.bf16.gmra.mxu1 %vm513_vm0, %v2548_v40 }
  0x72   : > { %2832 = vmatprep.mubr.msk.bf16.mxu0 %vm513_vm0, %v3424_v10  ;;  %2854 = vmatprep.mubr.msk.bf16.mxu1 %vm513_vm0, %v2549_v29 }
  0x79   : > { %2833 = vmatmul.mubr.msk.bf16.gmra.mxu0 %vm513_vm0, %v3457_v62  ;;  %2855 = vmatmul.mubr.msk.bf16.gmra.mxu1 %vm513_vm0, %v2586_v49 }
  0x7a   : > { %2836 = vmatprep.mubr.msk.bf16.mxu0 %vm513_vm0, %v3471_v18  ;;  %2878 = vmatprep.mubr.msk.bf16.mxu1 %vm513_vm0, %v3349_v43 }
  0x81   : > { %2837 = vmatmul.mubr.msk.bf16.gmra.mxu0 %vm513_vm0, %v3579_v48  ;;  %2879 = vmatmul.mubr.msk.bf16.vlgmr.msra.gmra.mxu1 %vm513_vm0, %v3376_v8 }
  0x82   : > { %2860 = vmatprep.mubr.msk.bf16.mxu0 %vm513_vm0, %v3296_v59  ;;  %2882 = vmatprep.mubr.msk.bf16.mxu1 %vm513_vm0, %v3400_v37  ;;  %v2598_v59 = vcombine.low %v3541_v39, %v3549_v15 }
  0x89   : > { %2861 = vmatmul.mubr.msk.bf16.vlgmr.msra.gmra.mxu0 %vm513_vm0, %v3328_v22  ;;  %2883 = vmatmul.mubr.msk.bf16.gmra.mxu1 %vm513_vm0, %v3424_v10 }
  0x8a   : > { %2895 = vmatpush3.bf16.msra.mxu0 %v3030_v21  ;;  %2864 = vmatprep.mubr.msk.bf16.mxu0 %vm513_vm0, %v3356_v52 }
  0x8b   : > { %2886 = vmatprep.mubr.msk.bf16.mxu1 %vm513_vm0, %v3457_v62 }
  0x91   : > { %2865 = vmatmul.mubr.msk.bf16.gmra.mxu0 %vm513_vm0, %v3388_v26  ;;  %2887 = vmatmul.mubr.msk.bf16.gmra.mxu1 %vm513_vm0, %v3471_v18 }
  0x92   : > { %2868 = vmatprep.mubr.msk.bf16.mxu0 %vm513_vm0, %v3416_v57  ;;  %2890 = vmatprep.mubr.msk.bf16.mxu1 %vm513_vm0, %v3579_v48 }
  0x99   : > { %2869 = vmatmul.mubr.msk.bf16.gmra.mxu0 %vm513_vm0, %v3436_v32  ;;  %2891 = vmatmul.mubr.msk.bf16.gmra.mxu1 %vm513_vm0, %v2610_v19 }
  0x9a   : > { %2872 = vmatprep.mubr.msk.bf16.mxu0 %vm513_vm0, %v2561_v28 }
  0xa1   : > { %2873 = vmatmul.mubr.msk.bf16.gmra.mxu0 %vm513_vm0, %v2598_v59 }
  0xa2   : > { %2896 = vmatprep.mubr.msk.bf16.mxu0 %vm513_vm0, %v3508_v4 }
  0xa9   : > { %2897 = vmatmul.mubr.msk.bf16.vlgmr.msra.gmra.mxu0 %vm513_vm0, %v3551_v20 }
  0xaa   : > { %2900 = vmatprep.mubr.msk.bf16.mxu0 %vm513_vm0, %v3560_v55 }
  0xb1   : > { %2901 = vmatmul.mubr.msk.bf16.gmra.mxu0 %vm513_vm0, %v3594_v12 }
  0xb2   : > { %2904 = vmatprep.mubr.msk.bf16.mxu0 %vm513_vm0, %v2548_v40 }
  0xb9   : > { %2905 = vmatmul.mubr.msk.bf16.gmra.mxu0 %vm513_vm0, %v2549_v29 }
  0xba   : > { %2908 = vmatprep.mubr.msk.bf16.mxu0 %vm513_vm0, %v2586_v49 }
  0xc1   : > { %2909 = vmatmul.mubr.msk.bf16.gmra.mxu0 %vm513_vm0, %v2623_v2 }
  0xde   : > { %v2772_v22 = vpop.f32.mrf.mxu1 }
  0xe0   : > { %v739_v43 = vpop.f32.mrf.mxu1 }
  0xe2   : > { %v2773_v52 = vpop.f32.mrf.mxu1 }
  0xe4   : > { %v742_v26 = vpop.f32.mrf.mxu1 }
  0xe5   : > { %v2754_v8 = vpop.f32.mrf.mxu0 }
  0xe6   : > { %v748_v37 = vadd.f32 %v2772_v22, %v2754_v8 }
  0xe7   : > { %v572_v57 = vpop.f32.mrf.mxu0  ;;  %v2776_v10 = vpop.f32.mrf.mxu1 }
  0xe8   : > { %v740_v32 = vadd.f32 %v739_v43, %v572_v57 }
  0xe9   : > { %v2755_v44 = vpop.f32.mrf.mxu0  ;;  %v755_v62 = vpop.f32.mrf.mxu1 }
  0xea   : > { %v751_v18 = vadd.f32 %v2773_v52, %v2755_v44  ;;  %v1993_v44 = vld [vmem:[%s3757_s30 + $0x78] sm:$0xff] }
  0xeb   : > { %v575_v4 = vpop.f32.mrf.mxu0  ;;  %v2777_v42 = vpop.f32.mrf.mxu1  ;;  %2912 = vmatprep.subr.mxu1 %v1993_v44 }
  0xec   : > { %v743_v39 = vadd.f32 %v742_v26, %v575_v4  ;;  %2913 = vmatpush3.msra.mxu1 %v1993_v44 }
  0xed   : > { %v758_v15 = vpop.f32.mrf.mxu1 }
  0xef   : > { %v2758_v20 = vpop.f32.mrf.mxu0 }
  0xf0   : > { %v764_v55 = vadd.f32 %v2776_v10, %v2758_v20 }
  0xf1   : > { %v588_v38 = vpop.f32.mrf.mxu0  ;;  %v2780_v41 = vpop.f32.mrf.mxu1 }
  0xf2   : > { %v756_v45 = vadd.f32 %v755_v62, %v588_v38  ;;  %v1992_v62 = vld [vmem:[%s3757_s30 + $0x70] sm:$0xff]  ;;  %v1990_v38 = vld [vmem:[%s3757_s30 + $0x60] sm:$0xff] }
  0xf3   : > { %v2759_v27 = vpop.f32.mrf.mxu0  ;;  %v771_v47 = vpop.f32.mrf.mxu1  ;;  %2914 = vmatprep.subr.mxu1 %v1992_v62 }
  0xf4   : > { %v767_v60 = vadd.f32 %v2777_v42, %v2759_v27  ;;  %2915 = vmatpush3.msra.mxu1 %v1992_v62 }
  0xf5   : > { %v591_v3 = vpop.f32.mrf.mxu0  ;;  %v2781_v23 = vpop.f32.mrf.mxu1 }
  0xf6   : > { %v759_v53 = vadd.f32 %v758_v15, %v591_v3 }
  0xf7   : > { %v774_v48 = vpop.f32.mrf.mxu1 }
  0xf8   : > { %v2762_v54 = vpop.f32.mrf.mxu0 }
  0xf9   : > { %v780_v61 = vadd.f32 %v2780_v41, %v2762_v54  ;;  %v2784_v14 = vpop.f32.mrf.mxu1 }
  0xfa   : > { %v604_v6 = vpop.f32.mrf.mxu0 }
  0xfb   : > { %v772_v63 = vadd.f32 %v771_v47, %v604_v6  ;;  %v787_v5 = vpop.f32.mrf.mxu1  ;;  %v1989_v47 = vld [vmem:[%s3757_s30 + $0x58] sm:$0xff] }
  0xfc   : > { %v2763_v0 = vpop.f32.mrf.mxu0 }
  0xfd   : > { %v3703_v9 = vadd.f32 %v2781_v23, %v2763_v0  ;;  %v2785_v13 = vpop.f32.mrf.mxu1 }
  0xfe   : > { %v607_v36 = vpop.f32.mrf.mxu0 }
  0xff   : > { %v3705_v16 = vadd.f32 %v774_v48, %v607_v36  ;;  %v790_v17 = vpop.f32.mrf.mxu1 }
 0x101   : > { %v2766_v12 = vpop.f32.mrf.mxu0  ;;  %v3707_v25 = vpop.f32.mrf.mxu1 }
 0x102   : > { %v3709_v51 = vadd.f32 %v2784_v14, %v2766_v12 }
 0x103   : > { %v620_v11 = vpop.f32.mrf.mxu0  ;;  %v3711_v28 = vpop.f32.mrf.mxu1 }
 0x104   : > { %v3713_v30 = vadd.f32 %v787_v5, %v620_v11 }
 0x105   : > { %v2767_v1 = vpop.f32.mrf.mxu0  ;;  %v3715_v40 = vpop.f32.mrf.mxu1 }
 0x106   : > { %v3717_v56 = vadd.f32 %v2785_v13, %v2767_v1 }
 0x107   : > { %v623_v24 = vpop.f32.mrf.mxu0  ;;  %v3719_v2 = vpop.f32.mrf.mxu1 }
 0x108   : > { %v3721_v19 = vadd.f32 %v790_v17, %v623_v24 }
 0x109   : > { %v2790_v58 = vpop.f32.mrf.mxu0  ;;  %v3723_v33 = vpop.f32.mrf.mxu1 }
 0x10a   : > { %v3725_v29 = vadd.f32 %v2790_v58, %v748_v37 }
 0x10b   : > { %v960_v21 = vpop.f32.mrf.mxu0  ;;  %v3727_v7 = vpop.f32.mrf.mxu1 }
 0x10c   : > { %v3729_v31 = vadd.f32 %v960_v21, %v740_v32 }
 0x10d   : > { %v2791_v46 = vpop.f32.mrf.mxu0  ;;  %v3731_v34 = vpop.f32.mrf.mxu1 }
 0x10e   : > { %v3733_v50 = vadd.f32 %v2791_v46, %v751_v18 }
 0x10f   : > { %v963_v35 = vpop.f32.mrf.mxu0  ;;  %v3735_v49 = vpop.f32.mrf.mxu1 }
 0x110   : > { %v3737_v59 = vadd.f32 %v963_v35, %v743_v39  ;;  %v1991_v39 = vld [vmem:[%s3757_s30 + $0x68] sm:$0xff] }
 0x111   : > { %v2794_v22 = vpop.f32.mrf.mxu0  ;;  %v3740_v43 = vpop.f32.mrf.mxu1  ;;  %2916 = vmatprep.subr.mxu1 %v1991_v39 }
 0x112   : > { %v3742_v52 = vadd.f32 %v2794_v22, %v764_v55  ;;  %2917 = vmatpush3.msra.mxu1 %v1991_v39 }
 0x113   : > { %v976_v8 = vpop.f32.mrf.mxu0  ;;  %v3747_v26 = vpop.f32.mrf.mxu1  ;;  %2918 = vmatprep.subr.mxu1 %v1990_v38 }
 0x114   : > { %v3749_v37 = vadd.f32 %v976_v8, %v756_v45  ;;  %2919 = vmatpush3.msra.mxu1 %v1990_v38 }
 0x115   : > { %v2795_v57 = vpop.f32.mrf.mxu0  ;;  %v3752_v10 = vpop.f32.mrf.mxu1  ;;  %2920 = vmatprep.subr.mxu1 %v1989_v47 }
 0x116   : > { %v3759_v32 = vadd.f32 %v2795_v57, %v767_v60  ;;  %2921 = vmatpush3.msra.mxu1 %v1989_v47 }
 0x117   : > { %v979_v18 = vpop.f32.mrf.mxu0  ;;  %v3763_v4 = vpop.f32.mrf.mxu1 }
 0x118   : > { %v3765_v42 = vadd.f32 %v979_v18, %v759_v53 }
 0x119   : > { %v2798_v15 = vpop.f32.mrf.mxu0  ;;  %v3768_v20 = vpop.f32.mrf.mxu1 }
 0x11a   : > { %4163 = vst [vmem:[#allocation2_spill] sm:$0xff] %v3768_v20  ;;  %v3770_v55 = vadd.f32 %v2798_v15, %v780_v61 }
 0x11b   : > { %v992_v41 = vpop.f32.mrf.mxu0  ;;  %v3773_v45 = vpop.f32.mrf.mxu1 }
 0x11c   : > { %4164 = vst [vmem:[#allocation3_spill] sm:$0xff] %v3773_v45  ;;  %v3775_v27 = vadd.f32 %v992_v41, %v772_v63  ;;  %v1153_v45 = vadd.f32 %v3711_v28, %v3729_v31 }
 0x11d   : > { %v2799_v60 = vpop.f32.mrf.mxu0  ;;  %v3778_v3 = vpop.f32.mrf.mxu1 }
 0x11e   : > { %4165 = vst [vmem:[#allocation4_spill] sm:$0xff] %v3778_v3  ;;  %v3781_v23 = vadd.f32 %v2799_v60, %v3703_v9 }
 0x11f   : > { %v995_v53 = vpop.f32.mrf.mxu0  ;;  %v3783_v54 = vpop.f32.mrf.mxu1 }
 0x120   : > { %4166 = vst [vmem:[#allocation5_spill] sm:$0xff] %v3783_v54  ;;  %v3786_v48 = vadd.f32 %v995_v53, %v3705_v16 }
 0x121   : > { %v2802_v61 = vpop.f32.mrf.mxu0  ;;  %v3788_v6 = vpop.f32.mrf.mxu1 }
 0x122   : > { %v3791_v14 = vadd.f32 %v2802_v61, %v3709_v51 }
 0x123   : > { %v1008_v63 = vpop.f32.mrf.mxu0  ;;  %v3793_v0 = vpop.f32.mrf.mxu1 }
 0x124   : > { %4167 = vst [vmem:[#allocation6_spill] sm:$0xff] %v3791_v14  ;;  %v3796_v5 = vadd.f32 %v1008_v63, %v3713_v30 }
 0x125   : > { %v2803_v9 = vpop.f32.mrf.mxu0  ;;  %v3798_v36 = vpop.f32.mrf.mxu1 }
 0x126   : > { %4168 = vst [vmem:[#allocation7_spill] sm:$0xff] %v3796_v5  ;;  %v3801_v13 = vadd.f32 %v2803_v9, %v3717_v56 }
 0x127   : > { %v1011_v16 = vpop.f32.mrf.mxu0  ;;  %v3803_v17 = vpop.f32.mrf.mxu1 }
 0x128   : > { %4169 = vst [vmem:[#allocation8_spill] sm:$0xff] %v3801_v13  ;;  %v3806_v12 = vadd.f32 %v1011_v16, %v3721_v19 }
 0x129   : > { %v2826_v51 = vpop.f32.mrf.mxu0  ;;  %v3808_v11 = vpop.f32.mrf.mxu1 }
 0x12a   : > { %4170 = vst [vmem:[#allocation9_spill] sm:$0xff] %v3806_v12 }
 0x12b   : > { %v1242_v1 = vpop.f32.mrf.mxu0  ;;  %v3810_v24 = vpop.f32.mrf.mxu1 }
 0x12d   : > { %v2827_v30 = vpop.f32.mrf.mxu0  ;;  %v3812_v58 = vpop.f32.mrf.mxu1 }
 0x12f   : > { %v1245_v21 = vpop.f32.mrf.mxu0  ;;  %v3814_v46 = vpop.f32.mrf.mxu1 }
 0x131   : > { %v3816_v56 = vpop.f32.mrf.mxu0  ;;  %v3818_v35 = vpop.f32.mrf.mxu1 }
 0x132   : > { %4171 = vst [vmem:[#allocation10_spill] sm:$0xff] %v3818_v35  ;;  %v1155_v35 = vadd.f32 %v3707_v25, %v3725_v29 }
 0x133   : > { %v1258_v22 = vpop.f32.mrf.mxu0  ;;  %v3820_v8 = vpop.f32.mrf.mxu1 }
 0x134   : > { %4172 = vst [vmem:[#allocation11_spill] sm:$0xff] %v3820_v8  ;;  %v1307_v5 = vadd.f32 %v2826_v51, %v1155_v35 }
 0x135   : > { %v3822_v19 = vpop.f32.mrf.mxu0  ;;  %v3824_v57 = vpop.f32.mrf.mxu1 }
 0x136   : > { %4173 = vst [vmem:[#allocation12_spill] sm:$0xff] %v3824_v57  ;;  %v1443_v25 = vadd.f32 %v3788_v6, %v1307_v5 }
 0x137   : > { %v3826_v44 = vpop.f32.mrf.mxu0  ;;  %v3828_v62 = vpop.f32.mrf.mxu1 }
 0x138   : > { %4174 = vst [vmem:[#allocation13_spill] sm:$0xff] %v3828_v62 }
 0x139   : > { %v3830_v18 = vpop.f32.mrf.mxu0  ;;  %v3832_v39 = vpop.f32.mrf.mxu1 }
 0x13a   : > { %4175 = vst [vmem:[#allocation14_spill] sm:$0xff] %v3832_v39 }
 0x13b   : > { %v3834_v15 = vpop.f32.mrf.mxu0  ;;  %v3836_v38 = vpop.f32.mrf.mxu1 }
 0x13c   : > { %4176 = vst [vmem:[#allocation15_spill] sm:$0xff] %v3836_v38 }
 0x13d   : > { %v3838_v41 = vpop.f32.mrf.mxu0  ;;  %v3842_v60 = vpop.f32.mrf.mxu1 }
 0x13e   : > { %4177 = vst [vmem:[#allocation16_spill] sm:$0xff] %v3838_v41  ;;  %4179 = vst [vmem:[#allocation18_spill] sm:$0xff] %v3842_v60 }
 0x13f   : > { %v3840_v47 = vpop.f32.mrf.mxu0  ;;  %v3848_v63 = vpop.f32.mrf.mxu1 }
 0x140   : > { %4178 = vst [vmem:[#allocation17_spill] sm:$0xff] %v3840_v47  ;;  %4182 = vst [vmem:[#allocation21_spill] sm:$0xff] %v3848_v63  ;;  %v1305_v47 = vadd.f32 %v1242_v1, %v1153_v45 }
 0x141   : > { %v3844_v53 = vpop.f32.mrf.mxu0  ;;  %v2880_v39 = vpop.f32.mrf.mxu1 }
 0x142   : > { %4180 = vst [vmem:[#allocation19_spill] sm:$0xff] %v3844_v53  ;;  %v1441_v31 = vadd.f32 %v3793_v0, %v1305_v47 }
 0x143   : > { %v3846_v61 = vpop.f32.mrf.mxu0  ;;  %v1660_v38 = vpop.f32.mrf.mxu1 }
 0x144   : > { %4181 = vst [vmem:[#allocation20_spill] sm:$0xff] %v3846_v61 }
 0x145   : > { %v3850_v9 = vpop.f32.mrf.mxu0  ;;  %v2881_v12 = vpop.f32.mrf.mxu1 }
 0x146   : > { %4183 = vst [vmem:[#allocation22_spill] sm:$0xff] %v3850_v9 }
 0x147   : > { %v3852_v16 = vpop.f32.mrf.mxu0  ;;  %v1663_v60 = vpop.f32.mrf.mxu1 }
 0x148   : > { %4184 = vst [vmem:[#allocation23_spill] sm:$0xff] %v3852_v16 }
 0x149   : > { %v2862_v3 = vpop.f32.mrf.mxu0  ;;  %v3858_v61 = vpop.f32.mrf.mxu1 }
 0x14a   : > { %4186 = vst [vmem:[#allocation25_spill] sm:$0xff] %v3858_v61  ;;  %v1573_v35 = vadd.f32 %v2862_v3, %v1443_v25 }
 0x14b   : > { %v1508_v13 = vpop.f32.mrf.mxu0  ;;  %v3864_v16 = vpop.f32.mrf.mxu1 }
 0x14c   : > { %v1571_v1 = vadd.f32 %v1508_v13, %v1441_v31 }
 0x14d   : > { %v2863_v57 = vpop.f32.mrf.mxu0 }
 0x14f   : > { %v1511_v54 = vpop.f32.mrf.mxu0 }
 0x151   : > { %v3854_v62 = vpop.f32.mrf.mxu0 }
 0x153   : > { %v1524_v20 = vpop.f32.mrf.mxu0 }
 0x155   : > { %v3856_v53 = vpop.f32.mrf.mxu0 }
 0x156   : > { %4185 = vst [vmem:[#allocation24_spill] sm:$0xff] %v3856_v53  ;;  %v3874_v53 = vpop.f32.mrf.mxu1 }
 0x157   : > { %v3860_v63 = vpop.f32.mrf.mxu0 }
 0x159   : > { %v3862_v9 = vpop.f32.mrf.mxu0 }
 0x15a   : > { %4187 = vst [vmem:[#allocation26_spill] sm:$0xff] %v3862_v9  ;;  %v1156_v9 = vadd.f32 %v3715_v40, %v3733_v50  ;;  %v1157_v40 = vadd.f32 %v3727_v7, %v3749_v37  ;;  %v3906_v37 = vld [vmem:[%s4156_s2] ss:$0 sm:$0xff] }
 0x15b   : > { %v3866_v14 = vpop.f32.mrf.mxu0 }
 0x15c   : > { %4188 = vst [vmem:[#allocation27_spill] sm:$0xff] %v3866_v14  ;;  %v1154_v14 = vadd.f32 %v3719_v2, %v3737_v59  ;;  %v1308_v29 = vadd.f32 %v2827_v30, %v1156_v9  ;;  %v1159_v2 = vadd.f32 %v3723_v33, %v3742_v52  ;;  %v1309_v59 = vadd.f32 %v1258_v22, %v1157_v40 }
 0x15d   : > { %v3870_v41 = vpop.f32.mrf.mxu0  ;;  %v1158_v33 = vadd.f32 %v3735_v49, %v3765_v42  ;;  %v1723_v52 = vadd.f32 %v1660_v38, %v1571_v1  ;;  %v1161_v49 = vadd.f32 %v3747_v26, %v3775_v27  ;;  %v4192_v1 = vld [vmem:[#allocation25_spill] sm:$0xff] }
 0x15e   : > { %4189 = vst [vmem:[#allocation28_spill] sm:$0xff] %v3870_v41  ;;  %v3885_v41 = vpop.f32.mrf.mxu1  ;;  %v1306_v51 = vadd.f32 %v1245_v21, %v1154_v14  ;;  %v1444_v45 = vadd.f32 %v3798_v36, %v1308_v29  ;;  %v1725_v14 = vadd.f32 %v2880_v39, %v1573_v35  ;;  %v1311_v30 = vadd.f32 %v3816_v56, %v1159_v2  ;;  %v4190_v35 = vld [vmem:[#allocation11_spill] sm:$0xff]  ;;  %v4193_v2 = vld [vmem:[#allocation24_spill] sm:$0xff] }
 0x15f   : > { %v3876_v61 = vpop.f32.mrf.mxu0  ;;  %v1160_v21 = vadd.f32 %v3731_v34, %v3759_v32  ;;  %v1310_v56 = vadd.f32 %v3826_v44, %v1158_v33  ;;  %v1313_v25 = vadd.f32 %v3834_v15, %v1161_v49  ;;  %v4198_v33 = vld [vmem:[#allocation10_spill] sm:$0xff] }
 0x160   : > { %v3897_v6 = vpop.f32.mrf.mxu1  ;;  %v1442_v0 = vadd.f32 %v3803_v17, %v1306_v51  ;;  %v1574_v3 = vadd.f32 %v2863_v57, %v1444_v45  ;;  %v1445_v17 = vadd.f32 %v3810_v24, %v1309_v59  ;;  %v1447_v42 = vadd.f32 %v3808_v11, %v1311_v30 }
 0x161   : > { %v3880_v8 = vpop.f32.mrf.mxu0  ;;  %v1446_v27 = vadd.f32 %v3814_v46, %v1310_v56  ;;  %v1164_v51 = vadd.f32 %v3752_v10, %v3781_v23  ;;  %v1449_v40 = vadd.f32 %v4190_v35, %v1313_v25  ;;  %v4205_v25 = vld [vmem:[#allocation5_spill] sm:$0xff]  ;;  %v4208_v35 = vld [vmem:[#allocation8_spill] sm:$0xff] }
 0x162   : > { %v1572_v36 = vadd.f32 %v1511_v54, %v1442_v0  ;;  %v1692_v22 = vpop.f32.mrf.mxu1  ;;  %v1726_v39 = vadd.f32 %v2881_v12, %v1574_v3  ;;  %v1312_v54 = vadd.f32 %v3822_v19, %v1160_v21  ;;  %v1575_v32 = vadd.f32 %v1524_v20, %v1445_v17  ;;  %v4195_v0 = vld [vmem:[#allocation3_spill] sm:$0xff]  ;;  %v4196_v3 = vld [vmem:[#allocation16_spill] sm:$0xff]  ;;  %v4199_v17 = vld [vmem:[#allocation6_spill] sm:$0xff] }
 0x163   : > { %v3887_v28 = vpop.f32.mrf.mxu0  ;;  %v1163_v12 = vadd.f32 %v3740_v43, %v3770_v55  ;;  %v1577_v11 = vadd.f32 %v3854_v62, %v1447_v42  ;;  %v1576_v46 = vadd.f32 %v3860_v63, %v1446_v27  ;;  %v4194_v63 = vld [vmem:[#allocation7_spill] sm:$0xff]  ;;  %v1316_v30 = vadd.f32 %v4196_v3, %v1164_v51  ;;  %v4206_v27 = vld [vmem:[#allocation12_spill] sm:$0xff] }
 0x164   : > { %v1724_v34 = vadd.f32 %v1663_v60, %v1572_v36  ;;  %v3928_v29 = vpop.f32.mrf.mxu1  ;;  %v1162_v60 = vadd.f32 %v3763_v4, %v3786_v48  ;;  %v1448_v43 = vadd.f32 %v3812_v58, %v1312_v54  ;;  %v1727_v31 = vadd.f32 %v3864_v16, %v1575_v32  ;;  %v4191_v58 = vld [vmem:[#allocation17_spill] sm:$0xff]  ;;  %v4203_v32 = vld [vmem:[#allocation26_spill] sm:$0xff] }
 0x165   : > { %v3892_v50 = vpop.f32.mrf.mxu0  ;;  %v1315_v15 = vadd.f32 %v3830_v18, %v1163_v12  ;;  %v1729_v18 = vadd.f32 %v4192_v1, %v1577_v11  ;;  %v1728_v36 = vadd.f32 %v3885_v41, %v1576_v46  ;;  %v4202_v54 = vld [vmem:[#allocation13_spill] sm:$0xff]  ;;  %v1452_v11 = vadd.f32 %v4206_v27, %v1316_v30  ;;  %v4211_v1 = vld [vmem:[#allocation23_spill] sm:$0xff]  ;;  %v4214_v30 = vld [vmem:[#allocation22_spill] sm:$0xff] }
 0x166   : > { %v1695_v4 = vpop.f32.mrf.mxu1  ;;  %v1314_v45 = vadd.f32 %v4191_v58, %v1162_v60  ;;  %v1578_v16 = vadd.f32 %v4193_v2, %v1448_v43  ;;  %v4204_v12 = vld [vmem:[#allocation9_spill] sm:$0xff]  ;;  %v4210_v58 = vld [vmem:[#allocation15_spill] sm:$0xff] }
 0x167   : > { %v3899_v5 = vpop.f32.mrf.mxu0 }
 0x168   : > { %v3965_v49 = vpop.f32.mrf.mxu1 }
 0x169   : > { %v2898_v7 = vpop.f32.mrf.mxu0 }
 0x16a   : > { %v1861_v13 = vadd.f32 %v2898_v7, %v1725_v14  ;;  %v1165_v14 = vadd.f32 %v4195_v0, %v4194_v63  ;;  %v4197_v7 = vld [vmem:[#allocation27_spill] sm:$0xff] }
 0x16b   : > { %v1796_v57 = vpop.f32.mrf.mxu0  ;;  %v1579_v10 = vadd.f32 %v4197_v7, %v1449_v40  ;;  %v4209_v40 = vld [vmem:[#allocation4_spill] sm:$0xff] }
 0x16c   : > { %v1859_v47 = vadd.f32 %v1796_v57, %v1723_v52  ;;  %v3915_v9 = vadd.f32 %v3906_v37, %v1861_v13  ;;  %v1451_v52 = vadd.f32 %v4198_v33, %v1315_v15  ;;  %v4200_v57 = vld [vmem:[#allocation2_spill] sm:$0xff]  ;;  %v1988_v15 = vld [vmem:[%s3757_s30 + $0x50] sm:$0xff] }
 0x16d   : > { %v2899_v38 = vpop.f32.mrf.mxu0  ;;  %v1167_v56 = vadd.f32 %v4200_v57, %v4199_v17  ;;  %v1731_v43 = vadd.f32 %v1692_v22, %v1579_v10  ;;  %2922 = vmatprep.subr.mxu1 %v1988_v15  ;;  %v1986_v33 = vld [vmem:[%s3757_s30 + $0x40] sm:$0xff]  ;;  %v4215_v17 = vld [vmem:[#allocation21_spill] sm:$0xff] }
 0x16e   : > { %v1862_v24 = vadd.f32 %v2899_v38, %v1726_v39  ;;  %1902 = vmax.xlane.f32.xlu1 %v3915_v9  ;;  %v3923_v44 = vadd.f32 %v3906_v37, %v1859_v47  ;;  %v4201_v39 = vld [vmem:[#allocation20_spill] sm:$0xff]  ;;  %v1450_v38 = vadd.f32 %v4202_v54, %v1314_v45  ;;  %2923 = vmatpush3.msra.mxu1 %v1988_v15  ;;  %v4216_v54 = vld [vmem:[#allocation18_spill] sm:$0xff] }
 0x16f   : > { %v1799_v26 = vpop.f32.mrf.mxu0  ;;  %v1317_v47 = vadd.f32 %v4201_v39, %v1165_v14  ;;  %v4213_v14 = vld [vmem:[#allocation14_spill] sm:$0xff] }
 0x170   : > { %v1860_v19 = vadd.f32 %v1799_v26, %v1724_v34  ;;  %1898 = vmax.xlane.f32.xlu0 %v3923_v44  ;;  %v3934_v20 = vadd.f32 %v3906_v37, %v1862_v24  ;;  %v1730_v34 = vadd.f32 %v3874_v53, %v1578_v16  ;;  %v1581_v24 = vadd.f32 %v4203_v32, %v1451_v52 }
 0x171   : > { %v2902_v55 = vpop.f32.mrf.mxu0  ;;  %v1166_v26 = vadd.f32 %v4205_v25, %v4204_v12  ;;  %v1453_v45 = vadd.f32 %v4210_v58, %v1317_v47  ;;  %v1985_v47 = vld [vmem:[%s3757_s30 + $0x38] sm:$0xff] }
 0x172   : > { %1904 = vmax.xlane.f32.xlu1 %v3934_v20  ;;  %v3944_v62 = vadd.f32 %v3906_v37, %v1860_v19  ;;  %v1865_v13 = vadd.f32 %v2902_v55, %v1729_v18  ;;  %v4207_v19 = vld [vmem:[#allocation19_spill] sm:$0xff]  ;;  %v1708_v18 = vpop.f32.mrf.mxu1  ;;  %v1733_v16 = vadd.f32 %v3897_v6, %v1581_v24 }
 0x173   : > { %v1812_v48 = vpop.f32.mrf.mxu0  ;;  %v1319_v60 = vadd.f32 %v4207_v19, %v1167_v56  ;;  %v1318_v22 = vadd.f32 %v4211_v1, %v1166_v26  ;;  %v1583_v10 = vadd.f32 %v3887_v28, %v1453_v45  ;;  %v1981_v45 = vld [vmem:[%s3757_s30 + $0x18] sm:$0xff]  ;;  %v1980_v1 = vld [vmem:[%s3757_s30 + $0x10] sm:$0xff] }
 0x174   : > { %v1863_v59 = vadd.f32 %v1812_v48, %v1727_v31  ;;  %1900 = vmax.xlane.f32.xlu0 %v3944_v62  ;;  %v1580_v31 = vadd.f32 %v3876_v61, %v1450_v38  ;;  %v3978_v53 = vadd.f32 %v3906_v37, %v1865_v13  ;;  %v1168_v48 = vadd.f32 %v4209_v40, %v4208_v35  ;;  %v1987_v61 = vld [vmem:[%s3757_s30 + $0x48] sm:$0xff]  ;;  %v2893_v56 = vpop.f32.mrf.mxu1 }
 0x175   : > { %v2903_v23 = vpop.f32.mrf.mxu0  ;;  %v1455_v3 = vadd.f32 %v4213_v14, %v1319_v60  ;;  %2924 = vmatprep.subr.mxu1 %v1987_v61  ;;  %v1454_v57 = vadd.f32 %v4215_v17, %v1318_v22 }
 0x176   : > { %v3960_v21 = vadd.f32 %v3906_v37, %v1863_v59  ;;  %v1866_v46 = vadd.f32 %v2903_v23, %v1730_v34  ;;  %v4212_v59 = vld [vmem:[#allocation28_spill] sm:$0xff]  ;;  %v1320_v7 = vadd.f32 %v4214_v30, %v1168_v48  ;;  %v1732_v52 = vadd.f32 %v1695_v4, %v1580_v31  ;;  %2925 = vmatpush3.msra.mxu1 %v1987_v61  ;;  %v1711_v25 = vpop.f32.mrf.mxu1 }
 0x177   : > { %v1815_v42 = vpop.f32.mrf.mxu0  ;;  %v1582_v63 = vadd.f32 %v4212_v59, %v1452_v11  ;;  %2926 = vmatprep.subr.mxu1 %v1986_v33  ;;  %v1735_v34 = vadd.f32 %v1708_v18, %v1583_v10  ;;  %v1584_v24 = vadd.f32 %v3899_v5, %v1454_v57  ;;  %v1983_v5 = vld [vmem:[%s3757_s30 + $0x28] sm:$0xff] }
 0x178   : > { %v1864_v41 = vadd.f32 %v1815_v42, %v1728_v36  ;;  %1906 = vmax.xlane.f32.xlu0 %v3960_v21  ;;  %v3997_v6 = vadd.f32 %v3906_v37, %v1866_v46  ;;  %v1585_v42 = vadd.f32 %v3880_v8, %v1455_v3  ;;  %v1456_v38 = vadd.f32 %v4216_v54, %v1320_v7  ;;  %v1984_v8 = vld [vmem:[%s3757_s30 + $0x30] sm:$0xff]  ;;  %v1979_v18 = vld [vmem:[%s3757_s30 + $0x8] sm:$0xff] }
 0x179   : > { %v2906_v55 = vpop.f32.mrf.mxu0  ;;  %v1734_v28 = vadd.f32 %v3928_v29, %v1582_v63  ;;  %2927 = vmatpush3.msra.mxu1 %v1986_v33 }
 0x17a   : > { %v3981_v51 = vadd.f32 %v3906_v37, %v1864_v41  ;;  %v1869_v36 = vadd.f32 %v2906_v55, %v1733_v16  ;;  %2928 = vmatprep.subr.mxu1 %v1985_v47  ;;  %v1737_v27 = vadd.f32 %v3965_v49, %v1585_v42  ;;  %v1586_v11 = vadd.f32 %v3892_v50, %v1456_v38  ;;  %v1982_v50 = vld [vmem:[%s3757_s30 + $0x20] sm:$0xff] }
 0x17b   : > { %v1828_v2 = vpop.f32.mrf.mxu0  ;;  %2929 = vmatpush3.msra.mxu1 %v1985_v47 }
 0x17c   : > { %v1867_v0 = vadd.f32 %v1828_v2, %v1731_v43  ;;  %1910 = vmax.xlane.f32.xlu0 %v3978_v53  ;;  %1908 = vmax.xlane.f32.xlu1 %v3981_v51  ;;  %v4011_v12 = vadd.f32 %v3906_v37, %v1869_v36  ;;  %v1736_v43 = vadd.f32 %v1711_v25, %v1584_v24  ;;  %v1978_v2 = vld [vmem:[%s3757_s30] sm:$0xff] }
 0x17d   : > { %v2907_v23 = vpop.f32.mrf.mxu0  ;;  %2930 = vmatprep.subr.mxu1 %v1984_v8  ;;  %v1738_v46 = vadd.f32 %v2893_v56, %v1586_v11 }
 0x17e   : > { %v4000_v13 = vadd.f32 %v3906_v37, %v1867_v0  ;;  %v1870_v41 = vadd.f32 %v2907_v23, %v1734_v28  ;;  %2931 = vmatpush3.msra.mxu1 %v1984_v8 }
 0x17f   : > { %v1831_v39 = vpop.f32.mrf.mxu0  ;;  %2932 = vmatprep.subr.mxu1 %v1983_v5 }
 0x180   : > { %v1868_v4 = vadd.f32 %v1831_v39, %v1732_v52  ;;  %1912 = vmax.xlane.f32.xlu1 %v3997_v6  ;;  %1914 = vmax.xlane.f32.xlu0 %v4000_v13  ;;  %v4023_v15 = vadd.f32 %v3906_v37, %v1870_v41 }
 0x181   : > { %v2910_v32 = vpop.f32.mrf.mxu0  ;;  %2933 = vmatpush3.msra.mxu1 %v1983_v5 }
 0x182   : > { %v4014_v29 = vadd.f32 %v3906_v37, %v1868_v4  ;;  %v1873_v55 = vadd.f32 %v2910_v32, %v1737_v27  ;;  %2934 = vmatprep.subr.mxu1 %v1982_v50 }
 0x183   : > { %v1844_v26 = vpop.f32.mrf.mxu0  ;;  %2935 = vmatpush3.msra.mxu1 %v1982_v50 }
 0x184   : > { %v1871_v19 = vadd.f32 %v1844_v26, %v1735_v34  ;;  %1918 = vmax.xlane.f32.xlu0 %v4011_v12  ;;  %1916 = vmax.xlane.f32.xlu1 %v4014_v29  ;;  %v4032_v48 = vadd.f32 %v3906_v37, %v1873_v55 }
 0x185   : > { %v2911_v60 = vpop.f32.mrf.mxu0  ;;  %2936 = vmatprep.subr.mxu1 %v1981_v45 }
 0x186   : > { %v4026_v31 = vadd.f32 %v3906_v37, %v1871_v19  ;;  %v1874_v40 = vadd.f32 %v2911_v60, %v1738_v46  ;;  %2937 = vmatpush3.msra.mxu1 %v1981_v45 }
 0x187   : > { %v1847_v49 = vpop.f32.mrf.mxu0  ;;  %2938 = vmatprep.subr.mxu1 %v1980_v1 }
 0x188   : > { %v1872_v35 = vadd.f32 %v1847_v49, %v1736_v43  ;;  %1920 = vmax.xlane.f32.xlu1 %v4023_v15  ;;  %1922 = vmax.xlane.f32.xlu0 %v4026_v31  ;;  %v4042_v22 = vadd.f32 %v3906_v37, %v1874_v40 }
 0x189   : > { %2939 = vmatpush3.msra.mxu1 %v1980_v1 }
 0x18a   : > { %v4035_v58 = vadd.f32 %v3906_v37, %v1872_v35  ;;  %2940 = vmatprep.subr.mxu1 %v1979_v18 }
 0x18b   : > { %2941 = vmatpush3.msra.mxu1 %v1979_v18 }
 0x18c   : > { %1926 = vmax.xlane.f32.xlu0 %v4032_v48  ;;  %1924 = vmax.xlane.f32.xlu1 %v4035_v58 }
 0x18d   : > { %2942 = vmatprep.subr.mxu1 %v1978_v2 }
 0x18e   : > { %2943 = vmatpush3.msra.mxu1 %v1978_v2 }
 0x190   : > { %1928 = vmax.xlane.f32.xlu1 %v4042_v22 }
 0x1f7   : > { %v1903_v61 = vpop.xlane.xlu1 %1902 }
 0x1f8   : > { %v1932_v63 = vsub.f32 %v3915_v9, %v1903_v61 }
 0x1f9   : > { %v1899_v16 = vpop.xlane.xlu0 %1898 }
 0x1fa   : > { %v1930_v59 = vsub.f32 %v3923_v44, %v1899_v16  ;;  %v1950_v7 = vmul.f32 1.442695, %v1932_v63  ;;  %v3137_v63 = vmov 0  }
 0x1fb   : > { %v1905_v0 = vpop.xlane.xlu1 %1904  ;;  %3011 = vset.pattern.permute.xlu1 %v3137_v63  ;;  %3012 = vset.pattern.permute.xlu0 %v3137_v63 }
 0x1fc   : > { %v1946_v37 = vmul.f32 1.442695, %v1930_v59  ;;  %v1933_v14 = vsub.f32 %v3934_v20, %v1905_v0 }
 0x1fd   : > { %v1901_v3 = vpop.xlane.xlu0 %1900 }
 0x1fe   : > { %3032 = vpow2.f32 %v1946_v37  ;;  %v1931_v30 = vsub.f32 %v3944_v62, %v1901_v3  ;;  %v1952_v23 = vmul.f32 1.442695, %v1933_v14 }
 0x200   : > { %v1948_v10 = vmul.f32 1.442695, %v1931_v30 }
 0x201   : > { %v1907_v33 = vpop.xlane.xlu0 %1906 }
 0x202   : > { %3034 = vpow2.f32 %v1948_v10  ;;  %v1934_v52 = vsub.f32 %v3960_v21, %v1907_v33 }
 0x203   : > { %3036 = vpow2.f32 %v1950_v7 }
 0x204   : > { %v1954_v36 = vmul.f32 1.442695, %v1934_v52  ;;  %3038 = vpow2.f32 %v1952_v23 }
 0x205   : > { %v1911_v44 = vpop.xlane.xlu0 %1910  ;;  %v1909_v9 = vpop.xlane.xlu1 %1908 }
 0x206   : > { %3040 = vpow2.f32 %v1954_v36  ;;  %v1936_v17 = vsub.f32 %v3978_v53, %v1911_v44  ;;  %v1935_v20 = vsub.f32 %v3981_v51, %v1909_v9 }
 0x208   : > { %v1958_v57 = vmul.f32 1.442695, %v1936_v17  ;;  %v1956_v56 = vmul.f32 1.442695, %v1935_v20 }
 0x209   : > { %v1913_v62 = vpop.xlane.xlu1 %1912  ;;  %v1915_v39 = vpop.xlane.xlu0 %1914 }
 0x20a   : > { %3042 = vpow2.f32 %v1958_v57  ;;  %v1937_v47 = vsub.f32 %v3997_v6, %v1913_v62  ;;  %v1938_v28 = vsub.f32 %v4000_v13, %v1915_v39 }
 0x20b   : > { %v3033_v21 = vpop.eup %3032  ;;  %3044 = vpow2.f32 %v1956_v56 }
 0x20c   : > { %v1960_v42 = vmul.f32 1.442695, %v1937_v47  ;;  %v1962_v4 = vmul.f32 1.442695, %v1938_v28  ;;  %2944 = vmatprep.mubr.f32.mxu1 %v3033_v21 }
 0x20d   : > { %v1919_v54 = vpop.xlane.xlu0 %1918  ;;  %v1917_v38 = vpop.xlane.xlu1 %1916 }
 0x20e   : > { %3046 = vpow2.f32 %v1960_v42  ;;  %v1940_v53 = vsub.f32 %v4011_v12, %v1919_v54  ;;  %v1939_v51 = vsub.f32 %v4014_v29, %v1917_v38 }
 0x20f   : > { %v3035_v34 = vpop.eup %3034  ;;  %3048 = vpow2.f32 %v1962_v4 }
 0x210   : > { %v3037_v32 = vpop.eup %3036  ;;  %v1966_v24 = vmul.f32 1.442695, %v1940_v53  ;;  %v1964_v41 = vmul.f32 1.442695, %v1939_v51  ;;  %2945 = vmatmul.mubr.f32.vlgmr.msra.gmra.mxu1 %v3035_v34 }
 0x211   : > { %2947 = vmatprep.mubr.f32.mxu1 %v3037_v32  ;;  %v1921_v6 = vpop.xlane.xlu1 %1920  ;;  %v1923_v13 = vpop.xlane.xlu0 %1922 }
 0x212   : > { %v3039_v8 = vpop.eup %3038  ;;  %3050 = vpow2.f32 %v1966_v24  ;;  %v1941_v25 = vsub.f32 %v4023_v15, %v1921_v6  ;;  %v1942_v26 = vsub.f32 %v4026_v31, %v1923_v13 }
 0x213   : > { %v3041_v27 = vpop.eup %3040  ;;  %3052 = vpow2.f32 %v1964_v41 }
 0x214   : > { %v1968_v12 = vmul.f32 1.442695, %v1941_v25  ;;  %v1970_v11 = vmul.f32 1.442695, %v1942_v26  ;;  %2948 = vmatmul.mubr.f32.gmra.mxu1 %v3039_v8 }
 0x215   : > { %2950 = vmatprep.mubr.f32.mxu1 %v3041_v27  ;;  %v1927_v29 = vpop.xlane.xlu0 %1926  ;;  %v1925_v19 = vpop.xlane.xlu1 %1924 }
 0x216   : > { %3054 = vpow2.f32 %v1968_v12  ;;  %v1944_v5 = vsub.f32 %v4032_v48, %v1927_v29  ;;  %v1943_v60 = vsub.f32 %v4035_v58, %v1925_v19 }
 0x217   : > { %v3043_v43 = vpop.eup %3042  ;;  %3056 = vpow2.f32 %v1970_v11 }
 0x218   : > { %v3045_v55 = vpop.eup %3044  ;;  %v1974_v49 = vmul.f32 1.442695, %v1944_v5  ;;  %v1972_v15 = vmul.f32 1.442695, %v1943_v60 }
 0x219   : > { %2951 = vmatmul.mubr.f32.gmra.mxu1 %v3045_v55  ;;  %v1929_v31 = vpop.xlane.xlu1 %1928 }
 0x21a   : > { %3058 = vpow2.f32 %v1974_v49  ;;  %2953 = vmatprep.mubr.f32.mxu1 %v3043_v43  ;;  %v1945_v50 = vsub.f32 %v4042_v22, %v1929_v31 }
 0x21b   : > { %v3047_v46 = vpop.eup %3046  ;;  %3060 = vpow2.f32 %v1972_v15 }
 0x21c   : > { %v3049_v35 = vpop.eup %3048  ;;  %v1976_v40 = vmul.f32 1.442695, %v1945_v50 }
 0x21d   : > { %2954 = vmatmul.mubr.f32.gmra.mxu1 %v3047_v46 }
 0x21e   : > { %3062 = vpow2.f32 %v1976_v40  ;;  %2956 = vmatprep.mubr.f32.mxu1 %v3049_v35 }
 0x21f   : > { %v3051_v48 = vpop.eup %3050 }
 0x220   : > { %v3053_v58 = vpop.eup %3052 }
 0x221   : > { %2957 = vmatmul.mubr.f32.gmra.mxu1 %v3053_v58 }
 0x222   : > { %2959 = vmatprep.mubr.f32.mxu1 %v3051_v48 }
 0x223   : > { %v3055_v45 = vpop.eup %3054 }
 0x224   : > { %v3057_v1 = vpop.eup %3056 }
 0x225   : > { %2960 = vmatmul.mubr.f32.gmra.mxu1 %v3055_v45 }
 0x226   : > { %2962 = vmatprep.mubr.f32.mxu1 %v3057_v1 }
 0x227   : > { %v3059_v18 = vpop.eup %3058 }
 0x228   : > { %v3061_v2 = vpop.eup %3060 }
 0x229   : > { %2963 = vmatmul.mubr.f32.gmra.mxu1 %v3061_v2 }
 0x22a   : > { %2965 = vmatprep.mubr.f32.mxu1 %v3059_v18 }
 0x22b   : > { %v3063_v22 = vpop.eup %3062 }
 0x22d   : > { %2966 = vmatmul.mubr.f32.gmra.mxu1 %v3063_v22 }
 0x2d0   : > { %v2946_v61 = vpop.f32.mrf.mxu1 }
 0x2d1   : > { %2157 = vrot.lane.b32.xlu1 %v2946_v61, %s3136_s7 }
 0x2d2   : > { %v2060_v16 = vpop.f32.mrf.mxu1 }
 0x2d3   : > { %2155 = vrot.lane.b32.xlu0 %v2060_v16, %s3136_s7 }
 0x2d4   : > { %v2949_v59 = vpop.f32.mrf.mxu1 }
 0x2d5   : > { %2161 = vrot.lane.b32.xlu1 %v2949_v59, %s3136_s7 }
 0x2d6   : > { %v2070_v0 = vpop.f32.mrf.mxu1 }
 0x2d9   : > { %v4066_v37 = vpop.f32.mrf.mxu1  ;;  %2159 = vrot.lane.b32.xlu1 %v2070_v0, %s3136_s7 }
 0x2db   : > { %v2080_v14 = vpop.f32.mrf.mxu1 }
 0x2dc   : > { %2163 = vrot.lane.b32.xlu0 %v2080_v14, %s3136_s7 }
 0x2dd   : > { %v4070_v3 = vpop.f32.mrf.mxu1  ;;  %2165 = vrot.lane.b32.xlu1 %v4066_v37, %s3136_s7 }
 0x2df   : > { %v4074_v30 = vpop.f32.mrf.mxu1 }
 0x2e0   : > { %2167 = vrot.lane.b32.xlu0 %v4074_v30, %s3136_s7 }
 0x2e1   : > { %v4078_v7 = vpop.f32.mrf.mxu1  ;;  %2169 = vrot.lane.b32.xlu1 %v4070_v3, %s3136_s7 }
 0x2e3   : > { %v4082_v10 = vpop.f32.mrf.mxu1 }
 0x2e4   : > { %2171 = vrot.lane.b32.xlu0 %v4082_v10, %s3136_s7 }
 0x2e5   : > { %v4086_v23 = vpop.f32.mrf.mxu1  ;;  %2173 = vrot.lane.b32.xlu1 %v4078_v7, %s3136_s7 }
 0x2e7   : > { %v4090_v33 = vpop.f32.mrf.mxu1 }
 0x2e8   : > { %2175 = vrot.lane.b32.xlu0 %v4090_v33, %s3136_s7 }
 0x2e9   : > { %v4094_v52 = vpop.f32.mrf.mxu1  ;;  %2177 = vrot.lane.b32.xlu1 %v4086_v23, %s3136_s7 }
 0x2eb   : > { %v4098_v36 = vpop.f32.mrf.mxu1 }
 0x2ec   : > { %2179 = vrot.lane.b32.xlu0 %v4098_v36, %s3136_s7 }
 0x2ed   : > { %v4102_v44 = vpop.f32.mrf.mxu1  ;;  %2181 = vrot.lane.b32.xlu1 %v4094_v52, %s3136_s7 }
 0x2ef   : > { %v4106_v9 = vpop.f32.mrf.mxu1 }
 0x2f0   : > { %2183 = vrot.lane.b32.xlu0 %v4106_v9, %s3136_s7 }
 0x2f1   : > { %2185 = vrot.lane.b32.xlu1 %v4102_v44, %s3136_s7 }
 0x343   : > { %v2158_v17 = vpop.permute.xlu1 %2157 }
 0x344   : > { %3064 = vrcp.f32 %v2158_v17 }
 0x345   : > { %v2156_v20 = vpop.permute.xlu0 %2155 }
 0x346   : > { %3066 = vrcp.f32 %v2156_v20 }
 0x347   : > { %v2162_v57 = vpop.permute.xlu1 %2161 }
 0x348   : > { %3068 = vrcp.f32 %v2162_v57 }
 0x34b   : > { %v2160_v56 = vpop.permute.xlu1 %2159 }
 0x34c   : > { %3070 = vrcp.f32 %v2160_v56 }
 0x34e   : > { %v2164_v62 = vpop.permute.xlu0 %2163 }
 0x34f   : > { %3072 = vrcp.f32 %v2164_v62  ;;  %v2166_v39 = vpop.permute.xlu1 %2165 }
 0x350   : > { %3074 = vrcp.f32 %v2166_v39 }
 0x351   : > { %v3065_v47 = vpop.eup %3064 }
 0x352   : > { %v2168_v28 = vpop.permute.xlu0 %2167  ;;  %v2206_v21 = vmul.f32 %v3065_v47, %v2946_v61 }
 0x353   : > { %v3067_v42 = vpop.eup %3066  ;;  %3076 = vrcp.f32 %v2168_v28  ;;  %v2170_v4 = vpop.permute.xlu1 %2169 }
 0x354   : > { %3078 = vrcp.f32 %v2170_v4  ;;  %2255 = vperm.xlu1 %3011, %v2206_v21   ;;  %v2204_v54 = vmul.f32 %v3067_v42, %v2060_v16 }
 0x355   : > { %v3069_v38 = vpop.eup %3068 }
 0x356   : > { %v2172_v53 = vpop.permute.xlu0 %2171  ;;  %2252 = vperm.xlu0 %3012, %v2204_v54   ;;  %v2210_v34 = vmul.f32 %v3069_v38, %v2949_v59 }
 0x357   : > { %3080 = vrcp.f32 %v2172_v53  ;;  %v2174_v51 = vpop.permute.xlu1 %2173 }
 0x358   : > { %3082 = vrcp.f32 %v2174_v51 }
 0x359   : > { %v3071_v32 = vpop.eup %3070 }
 0x35a   : > { %v2176_v24 = vpop.permute.xlu0 %2175  ;;  %2261 = vperm.xlu0 %3012, %v2210_v34   ;;  %v2208_v41 = vmul.f32 %v3071_v32, %v2070_v0 }
 0x35b   : > { %3084 = vrcp.f32 %v2176_v24  ;;  %v2178_v6 = vpop.permute.xlu1 %2177 }
 0x35c   : > { %v3073_v13 = vpop.eup %3072  ;;  %3086 = vrcp.f32 %v2178_v6  ;;  %2258 = vperm.xlu1 %3011, %v2208_v41  }
 0x35d   : > { %v3075_v8 = vpop.eup %3074  ;;  %v2212_v26 = vmul.f32 %v3073_v13, %v2080_v14 }
 0x35e   : > { %v2180_v25 = vpop.permute.xlu0 %2179  ;;  %v2214_v27 = vmul.f32 %v3075_v8, %v4066_v37  ;;  %v2299_v37 = vlaneseq }
 0x35f   : > { %3088 = vrcp.f32 %v2180_v25  ;;  %v2182_v12 = vpop.permute.xlu1 %2181 }
 0x360   : > { %v3077_v11 = vpop.eup %3076  ;;  %3090 = vrcp.f32 %v2182_v12  ;;  %2264 = vperm.xlu1 %3011, %v2212_v26   ;;  %2267 = vperm.xlu0 %3012, %v2214_v27  }
 0x361   : > { %v3079_v29 = vpop.eup %3078  ;;  %v2216_v5 = vmul.f32 %v3077_v11, %v4074_v30  ;;  %v2300_v30 = vand.u32 127, %v2299_v37 }
 0x362   : > { %v2184_v19 = vpop.permute.xlu0 %2183  ;;  %v2218_v60 = vmul.f32 %v3079_v29, %v4070_v3 }
 0x363   : > { %3092 = vrcp.f32 %v2184_v19  ;;  %v2186_v43 = vpop.permute.xlu1 %2185 }
 0x364   : > { %v3081_v55 = vpop.eup %3080  ;;  %3094 = vrcp.f32 %v2186_v43  ;;  %2270 = vperm.xlu1 %3011, %v2216_v5   ;;  %2273 = vperm.xlu0 %3012, %v2218_v60  }
 0x365   : > { %v3083_v49 = vpop.eup %3082  ;;  %v2220_v15 = vmul.f32 %v3081_v55, %v4082_v10 }
 0x366   : > { %v2222_v31 = vmul.f32 %v3083_v49, %v4078_v7 }
 0x368   : > { %v3085_v50 = vpop.eup %3084  ;;  %2276 = vperm.xlu1 %3011, %v2220_v15   ;;  %2279 = vperm.xlu0 %3012, %v2222_v31  }
 0x369   : > { %v3087_v46 = vpop.eup %3086  ;;  %v2224_v35 = vmul.f32 %v3085_v50, %v4090_v33  ;;  %v2305_v33 = vadd.s32 4294967288, %v2300_v30 }
 0x36a   : > { %v2226_v40 = vmul.f32 %v3087_v46, %v4086_v23  ;;  %v2302_v23 = vshrl.u32 %v2299_v37, 7 }
 0x36c   : > { %v3089_v48 = vpop.eup %3088  ;;  %2282 = vperm.xlu1 %3011, %v2224_v35   ;;  %2285 = vperm.xlu0 %3012, %v2226_v40  }
 0x36d   : > { %v3091_v58 = vpop.eup %3090  ;;  %v2228_v45 = vmul.f32 %v3089_v48, %v4098_v36 }
 0x36e   : > { %v2230_v1 = vmul.f32 %v3091_v58, %v4094_v52 }
 0x370   : > { %v3093_v18 = vpop.eup %3092  ;;  %2288 = vperm.xlu1 %3011, %v2228_v45   ;;  %2291 = vperm.xlu0 %3012, %v2230_v1  }
 0x371   : > { %v3095_v2 = vpop.eup %3094  ;;  %v2232_v22 = vmul.f32 %v3093_v18, %v4106_v9  ;;  %v2308_v9 = vsub.s32 %v2305_v33, %v2302_v23 }
 0x372   : > { %v2234_v61 = vmul.f32 %v3095_v2, %v4102_v44  ;;  %v2303_v44 = vsub.s32 %v2300_v30, %v2302_v23 }
 0x374   : > { %2294 = vperm.xlu1 %3011, %v2232_v22   ;;  %2297 = vperm.xlu0 %3012, %v2234_v61  }
 0x3cf   : > { %v2256_v59 = vpop.permute.xlu1 %2255 }
 0x3d0   : > { %v2309_v54 = vrot.slane %v2256_v59, %v2308_v9 }
 0x3d1   : > { %v2253_v16 = vpop.permute.xlu0 %2252 }
 0x3d2   : > { %v2304_v39 = vrot.slane %v2253_v16, %v2303_v44 }
 0x3d4   : > { %v2311_v41 = vsel %vm2310_vm7, %v2309_v54, %v2304_v39 }
 0x3d5   : > { %v2262_v63 = vpop.permute.xlu0 %2261 }
 0x3d6   : > { %v2319_v47 = vrot.slane %v2262_v63, %v2308_v9 }
 0x3d7   : > { %v2259_v0 = vpop.permute.xlu1 %2258 }
 0x3d8   : > { %v2315_v17 = vrot.slane %v2259_v0, %v2303_v44 }
 0x3da   : > { %v2320_v38 = vsel %vm2310_vm7, %v2319_v47, %v2315_v17 }
 0x3db   : > { %v2268_v14 = vpop.permute.xlu0 %2267  ;;  %v2265_v3 = vpop.permute.xlu1 %2264  ;;  %v2376_v25 = vsel %vm2375_vm8, %v2320_v38, %v2311_v41 }
 0x3dc   : > { %v2328_v20 = vrot.slane %v2268_v14, %v2308_v9  ;;  %v2324_v57 = vrot.slane %v2265_v3, %v2303_v44 }
 0x3de   : > { %v2329_v34 = vsel %vm2310_vm7, %v2328_v20, %v2324_v57 }
 0x3df   : > { %v2274_v7 = vpop.permute.xlu0 %2273  ;;  %v2271_v10 = vpop.permute.xlu1 %2270  ;;  %v2378_v27 = vsel %vm2377_vm9, %v2329_v34, %v2376_v25 }
 0x3e0   : > { %v2337_v28 = vrot.slane %v2274_v7, %v2308_v9  ;;  %v2333_v21 = vrot.slane %v2271_v10, %v2303_v44 }
 0x3e2   : > { %v2338_v6 = vsel %vm2310_vm7, %v2337_v28, %v2333_v21 }
 0x3e3   : > { %v2280_v52 = vpop.permute.xlu0 %2279  ;;  %v2277_v36 = vpop.permute.xlu1 %2276  ;;  %v2380_v11 = vsel %vm2379_vm10, %v2338_v6, %v2378_v27 }
 0x3e4   : > { %v2346_v42 = vrot.slane %v2280_v52, %v2308_v9  ;;  %v2342_v4 = vrot.slane %v2277_v36, %v2303_v44 }
 0x3e6   : > { %v2347_v26 = vsel %vm2310_vm7, %v2346_v42, %v2342_v4 }
 0x3e7   : > { %v2286_v56 = vpop.permute.xlu0 %2285  ;;  %v2283_v62 = vpop.permute.xlu1 %2282  ;;  %v2382_v60 = vsel %vm2381_vm11, %v2347_v26, %v2380_v11 }
 0x3e8   : > { %v2355_v53 = vrot.slane %v2286_v56, %v2308_v9  ;;  %v2351_v51 = vrot.slane %v2283_v62, %v2303_v44 }
 0x3ea   : > { %v2356_v12 = vsel %vm2310_vm7, %v2355_v53, %v2351_v51 }
 0x3eb   : > { %v2292_v32 = vpop.permute.xlu0 %2291  ;;  %v2289_v24 = vpop.permute.xlu1 %2288  ;;  %v2384_v49 = vsel %vm2383_vm12, %v2356_v12, %v2382_v60 }
 0x3ec   : > { %v2364_v13 = vrot.slane %v2292_v32, %v2308_v9  ;;  %v2360_v8 = vrot.slane %v2289_v24, %v2303_v44 }
 0x3ee   : > { %v2365_v29 = vsel %vm2310_vm7, %v2364_v13, %v2360_v8 }
 0x3ef   : > { %v2298_v19 = vpop.permute.xlu0 %2297  ;;  %v2295_v5 = vpop.permute.xlu1 %2294  ;;  %v2386_v15 = vsel %vm2385_vm13, %v2365_v29, %v2384_v49 }
 0x3f0   : > { %v2373_v43 = vrot.slane %v2298_v19, %v2308_v9  ;;  %v2369_v55 = vrot.slane %v2295_v5, %v2303_v44 }
 0x3f2   : > { %v2374_v31 = vsel %vm2310_vm7, %v2373_v43, %v2369_v55 }
 0x3f3   : > { %v2388_v50 = vsel %vm2387_vm14, %v2374_v31, %v2386_v15 }
 0x3f4   : > { %2390 = vst.msk [vmem:[%s251_s11] sm:$0xff] %vm513_vm0, %v2388_v50 }
 0x3f5 PF: > { %s14_s19 = sadd.s32 1, %s3134_s19   ;;  %s4217_s15 = smov %s3126_s17 }
 0x3f6   : > { %p11_p8 = scmp.ge.s32.totalorder %s14_s19, 6   ;;  %s4218_s16 = smov %s3130_s18 }
 0x3f7   : > { %s4219_s17 = smov %s4222_s20  ;;  %s4220_s18 = smov %s4226_s21 }
 0x3f8   :  { %13 = sbr.rel (!%p11_p8) target bundleno = 3 (0x3), region = 77 }

</bundles_post_ra>
